<compile_context>
chip_gen: v6e
topology: v6e:2x2x1
jax: 0.10.0
libtpu: 0.0.40
codegen_flags: <defaults>
</compile_context>

<pallas_src>
import math
import functools

import jax
import jax.numpy as jnp
from jax.experimental import pallas as pl
from jax.experimental.pallas import tpu as pltpu


# ----------------------------- Pallas kernel -----------------------------

def _layernorm(x, g, b, eps=1e-5):
    mu = jnp.mean(x, axis=-1, keepdims=True)
    var = jnp.mean((x - mu) ** 2, axis=-1, keepdims=True)
    return (x - mu) * jax.lax.rsqrt(var + eps) * g + b


def _local_refine_kernel(src_ref, pos_ref,
                         wqkv_ref, bqkv_ref, wo_ref,
                         w1_ref, b1_ref, w2_ref, vecs_ref,
                         fcw_ref, fcb_ref,
                         o_ref, *, n_layer, nhead, d_k):
    """Full LocalRefine forward for one batch element (block = (1, L, ·)).

    Weight layouts (leading layer axis, packed host-side):
      wqkv : (n_layer, nhead, D, 3*d_k)   per-head [Wq | Wk | Wv] column slabs
      bqkv : (n_layer, nhead, 1, 3*d_k)
      wo   : (n_layer, nhead, d_k, D)     per-head rows of the output proj
      w1   : (n_layer, D, H), b1 : (n_layer, 1, H), w2 : (n_layer, H, D)
      vecs : (n_layer, 6, D)   rows = [bo, ln1_g, ln1_b, b2, ln2_g, ln2_b]
    """
    # in-kernel concat along the channel (lane) axis
    x = jnp.concatenate([src_ref[0], pos_ref[0]], axis=-1)          # (L, D)
    L, D = x.shape
    scale = 1.0 / math.sqrt(d_k)

    for layer in range(n_layer):                                    # static unroll
        vecs = vecs_ref[layer]                                      # (6, D)

        # --- multi-head self attention (q = k = v-source = x, no mask) ---
        # fused per-head QKV projection: head-leading batched contraction
        xb = jnp.broadcast_to(x[None], (nhead, L, D))               # (h, L, D)
        qkv = jnp.einsum("hld,hdk->hlk", xb, wqkv_ref[layer],
                         preferred_element_type=jnp.float32) + bqkv_ref[layer]
        q = qkv[..., :d_k]                                          # (h, L, d_k)
        k = qkv[..., d_k:2 * d_k]
        v = qkv[..., 2 * d_k:]

        s = jnp.einsum("hqd,hkd->hqk", q, k,
                       preferred_element_type=jnp.float32) * scale  # (h, L, L)
        s = s - jnp.max(s, axis=-1, keepdims=True)
        p = jnp.exp(s)
        p = p * pl.reciprocal(jnp.sum(p, axis=-1, keepdims=True), approx=True)
        a = jnp.einsum("hqk,hkd->hqd", p, v,
                       preferred_element_type=jnp.float32)          # (h, L, d_k)

        # output projection folded per head, then reduce over heads (== concat @ Wo)
        attn = jnp.sum(jnp.einsum("hld,hdo->hlo", a, wo_ref[layer],
                                  preferred_element_type=jnp.float32),
                       axis=0) + vecs[0:1]                          # (L, D)

        # --- residual + LayerNorm 1 (post-norm) ---
        y = _layernorm(x + attn, vecs[1:2], vecs[2:3])

        # --- MLP: Linear -> ReLU -> Linear ---
        h1 = jnp.maximum(
            jnp.dot(y, w1_ref[layer], preferred_element_type=jnp.float32)
            + b1_ref[layer], 0.0)
        h2 = jnp.dot(h1, w2_ref[layer],
                     preferred_element_type=jnp.float32) + vecs[3:4]

        # --- residual + LayerNorm 2 ---
        x = _layernorm(y + h2, vecs[4:5], vecs[5:6])

    # --- final Linear(in_dim, 2) ---
    o_ref[0] = jnp.dot(x, fcw_ref[...],
                       preferred_element_type=jnp.float32) + fcb_ref[...]


# ------------------------------- wrapper ---------------------------------

def local_refine(src, pos, packed, nhead):
    """src: (B, L, vis_dim), pos: (B, L, pos_dim) -> (B, L, 2)."""
    B, L, vis_dim = src.shape
    pos_dim = pos.shape[-1]
    D = vis_dim + pos_dim
    d_k = D // nhead
    n_layer = packed["wqkv"].shape[0]

    weights = (packed["wqkv"], packed["bqkv"], packed["wo"],
               packed["w1"], packed["b1"], packed["w2"], packed["vecs"],
               packed["fc_w"], packed["fc_b"])

    def full_spec(a):
        zeros = (0,) * a.ndim
        return pl.BlockSpec(a.shape, lambda b: zeros)   # constant block: no re-DMA

    kernel = functools.partial(_local_refine_kernel,
                               n_layer=n_layer, nhead=nhead, d_k=d_k)
    return pl.pallas_call(
        kernel,
        out_shape=jax.ShapeDtypeStruct((B, L, 2), jnp.float32),
        grid=(B,),
        in_specs=[pl.BlockSpec((1, L, vis_dim), lambda b: (b, 0, 0)),
                  pl.BlockSpec((1, L, pos_dim), lambda b: (b, 0, 0))]
                 + [full_spec(a) for a in weights],
        out_specs=pl.BlockSpec((1, L, 2), lambda b: (b, 0, 0)),
        compiler_params=pltpu.CompilerParams(dimension_semantics=("parallel",)),
    )(src, pos, *weights)


# ----------------------- parameters + host-side packing --------------------

def init_params(key, n_layer, in_dim, hidden_dim):
    layers = []
    for i in range(n_layer):
        keys = jax.random.split(jax.random.fold_in(key, i), 12)
        s = 0.05
        layer = dict(
            wq=jax.random.normal(keys[0], (in_dim, in_dim), jnp.float32) * s,
            bq=jax.random.normal(keys[1], (1, in_dim), jnp.float32) * s,
            wk=jax.random.normal(keys[2], (in_dim, in_dim), jnp.float32) * s,
            bk=jax.random.normal(keys[3], (1, in_dim), jnp.float32) * s,
            wv=jax.random.normal(keys[4], (in_dim, in_dim), jnp.float32) * s,
            bv=jax.random.normal(keys[5], (1, in_dim), jnp.float32) * s,
            wo=jax.random.normal(keys[6], (in_dim, in_dim), jnp.float32) * s,
            bo=jax.random.normal(keys[7], (1, in_dim), jnp.float32) * s,
            w1=jax.random.normal(keys[8], (in_dim, hidden_dim), jnp.float32) * s,
            b1=jax.random.normal(keys[9], (1, hidden_dim), jnp.float32) * s,
            w2=jax.random.normal(keys[10], (hidden_dim, in_dim), jnp.float32) * s,
            b2=jax.random.normal(keys[11], (1, in_dim), jnp.float32) * s,
            ln1_g=jnp.ones((1, in_dim), jnp.float32),
            ln1_b=jnp.zeros((1, in_dim), jnp.float32),
            ln2_g=jnp.ones((1, in_dim), jnp.float32),
            ln2_b=jnp.zeros((1, in_dim), jnp.float32),
        )
        layers.append(layer)
    kfc = jax.random.fold_in(key, 1000)
    return dict(layers=layers,
                fc_w=jax.random.normal(kfc, (in_dim, 2), jnp.float32) * 0.05,
                fc_b=jnp.zeros((1, 2), jnp.float32))


def _split_heads_cols(w, nhead):
    """(I, nhead*d_k) -> (nhead, I, d_k): per-head output-column slabs."""
    I, O = w.shape
    d_k = O // nhead
    return jnp.transpose(w.reshape(I, nhead, d_k), (1, 0, 2))


def pack_params(params, nhead):
    """Stack per-layer weights along a leading layer axis in the kernel layout."""
    def one(lp):
        wqkv = jnp.concatenate([_split_heads_cols(lp["wq"], nhead),
                                _split_heads_cols(lp["wk"], nhead),
                                _split_heads_cols(lp["wv"], nhead)], axis=-1)
        bqkv = jnp.concatenate([_split_heads_cols(lp["bq"], nhead),
                                _split_heads_cols(lp["bk"], nhead),
                                _split_heads_cols(lp["bv"], nhead)], axis=-1)
        D = lp["wo"].shape[-1]
        wo = lp["wo"].reshape(nhead, -1, D)                       # (h, d_k, D)
        vecs = jnp.concatenate([lp["bo"], lp["ln1_g"], lp["ln1_b"],
                                lp["b2"], lp["ln2_g"], lp["ln2_b"]], axis=0)  # (6, D)
        return wqkv, bqkv, wo, lp["w1"], lp["b1"], lp["w2"], vecs

    stacked = [jnp.stack(ts) for ts in zip(*[one(lp) for lp in params["layers"]])]
    packed = dict(zip(("wqkv", "bqkv", "wo", "w1", "b1", "w2", "vecs"), stacked))
    packed["fc_w"] = params["fc_w"]
    packed["fc_b"] = params["fc_b"]
    return packed


# ---------------------------- pure-JAX reference ----------------------------

def _ref_layer(x, p, nhead):
    B, L, D = x.shape
    d_k = D // nhead
    hi = jax.lax.Precision.HIGHEST

    def lin(a, w, b):
        return jnp.einsum("bld,do->blo", a, w, precision=hi) + b

    q, k, v = lin(x, p["wq"], p["bq"]), lin(x, p["wk"], p["bk"]), lin(x, p["wv"], p["bv"])
    q = q.reshape(B, L, nhead, d_k).transpose(0, 2, 1, 3)
    k = k.reshape(B, L, nhead, d_k).transpose(0, 2, 1, 3)
    v = v.reshape(B, L, nhead, d_k).transpose(0, 2, 1, 3)
    s = jnp.einsum("bhqd,bhkd->bhqk", q, k, precision=hi) / math.sqrt(d_k)
    pattn = jax.nn.softmax(s, axis=-1)
    a = jnp.einsum("bhqk,bhkd->bhqd", pattn, v, precision=hi)
    a = a.transpose(0, 2, 1, 3).reshape(B, L, D)
    a = lin(a, p["wo"], p["bo"])

    def ln(t, g, b, eps=1e-5):
        mu = jnp.mean(t, axis=-1, keepdims=True)
        var = jnp.mean((t - mu) ** 2, axis=-1, keepdims=True)
        return (t - mu) / jnp.sqrt(var + eps) * g + b

    y = ln(x + a, p["ln1_g"], p["ln1_b"])
    m = lin(jnp.maximum(lin(y, p["w1"], p["b1"]), 0.0), p["w2"], p["b2"])
    return ln(y + m, p["ln2_g"], p["ln2_b"])


def local_refine_ref(src, pos, params, nhead):
    out = jnp.concatenate([src, pos], axis=-1)
    for lp in params["layers"]:
        out = _ref_layer(out, lp, nhead)
    hi = jax.lax.Precision.HIGHEST
    return jnp.einsum("bld,do->blo", out, params["fc_w"], precision=hi) + params["fc_b"]


# ---------------------------------- main ------------------------------------

if __name__ == "__main__":
    n_layer, vis_dim, pos_dim, hidden_dim, nhead = 2, 20, 12, 64, 4
    in_dim = vis_dim + pos_dim        # 32
    B, L = 2, 8

    key = jax.random.PRNGKey(0)
    k_src, k_pos, k_par = jax.random.split(key, 3)
    src = jax.random.normal(k_src, (B, L, vis_dim), jnp.float32)
    pos = jax.random.normal(k_pos, (B, L, pos_dim), jnp.float32)
    params = init_params(k_par, n_layer, in_dim, hidden_dim)
    packed = pack_params(params, nhead)

    out = jax.block_until_ready(local_refine(src, pos, packed, nhead))
    assert out.shape == (B, L, 2), out.shape

    ref = jax.block_until_ready(local_refine_ref(src, pos, params, nhead))
    max_err = float(jnp.max(jnp.abs(out - ref)))
    assert jnp.allclose(out, ref, atol=2e-3, rtol=2e-3), max_err

    print("KERNEL_OK")
</pallas_src>

<mosaic_0001>
module attributes {stable_mosaic.version = 11 : i64} {
  func.func @_local_refine_kernel(%arg0: i32, %arg1: memref<1x8x20xf32, #tpu.memory_space<vmem>>, %arg2: memref<1x8x12xf32, #tpu.memory_space<vmem>>, %arg3: memref<2x4x32x24xf32, #tpu.memory_space<vmem>>, %arg4: memref<2x4x1x24xf32, #tpu.memory_space<vmem>>, %arg5: memref<2x4x8x32xf32, #tpu.memory_space<vmem>>, %arg6: memref<2x32x64xf32, #tpu.memory_space<vmem>>, %arg7: memref<2x1x64xf32, #tpu.memory_space<vmem>>, %arg8: memref<2x64x32xf32, #tpu.memory_space<vmem>>, %arg9: memref<2x6x32xf32, #tpu.memory_space<vmem>>, %arg10: memref<32x2xf32, #tpu.memory_space<vmem>>, %arg11: memref<1x2xf32, #tpu.memory_space<vmem>>, %arg12: memref<1x8x2xf32, #tpu.memory_space<vmem>>) attributes {dimension_semantics = [#tpu.dimension_semantics<parallel>], iteration_bounds = array<i64: 2>, scalar_prefetch = 0 : i64, scratch_operands = 0 : i64, tpu.core_type = #tpu.core_type<tc>, window_params = [{transform_indices = @transform_0, window_bounds = array<i64: 1, 8, 20>}, {transform_indices = @transform_1, window_bounds = array<i64: 1, 8, 12>}, {pipeline_mode = #tpu.pipeline_mode<synchronous>, transform_indices = @transform_2, window_bounds = array<i64: 2, 4, 32, 24>}, {pipeline_mode = #tpu.pipeline_mode<synchronous>, transform_indices = @transform_3, window_bounds = array<i64: 2, 4, 1, 24>}, {pipeline_mode = #tpu.pipeline_mode<synchronous>, transform_indices = @transform_4, window_bounds = array<i64: 2, 4, 8, 32>}, {pipeline_mode = #tpu.pipeline_mode<synchronous>, transform_indices = @transform_5, window_bounds = array<i64: 2, 32, 64>}, {pipeline_mode = #tpu.pipeline_mode<synchronous>, transform_indices = @transform_6, window_bounds = array<i64: 2, 1, 64>}, {pipeline_mode = #tpu.pipeline_mode<synchronous>, transform_indices = @transform_7, window_bounds = array<i64: 2, 64, 32>}, {pipeline_mode = #tpu.pipeline_mode<synchronous>, transform_indices = @transform_8, window_bounds = array<i64: 2, 6, 32>}, {pipeline_mode = #tpu.pipeline_mode<synchronous>, transform_indices = @transform_9, window_bounds = array<i64: 32, 2>}, {pipeline_mode = #tpu.pipeline_mode<synchronous>, transform_indices = @transform_10, window_bounds = array<i64: 1, 2>}, {transform_indices = @transform_11, window_bounds = array<i64: 1, 8, 2>}]} {
    %c0 = arith.constant 0 : index
    %c0_0 = arith.constant 0 : index
    %c0_1 = arith.constant 0 : index
    %0 = vector.load %arg1[%c0, %c0_0, %c0_1] : memref<1x8x20xf32, #tpu.memory_space<vmem>>, vector<1x8x20xf32>
    %1 = vector.shape_cast %0 : vector<1x8x20xf32> to vector<8x20xf32>
    %c0_2 = arith.constant 0 : index
    %c0_3 = arith.constant 0 : index
    %c0_4 = arith.constant 0 : index
    %2 = vector.load %arg2[%c0_2, %c0_3, %c0_4] : memref<1x8x12xf32, #tpu.memory_space<vmem>>, vector<1x8x12xf32>
    %3 = vector.shape_cast %2 : vector<1x8x12xf32> to vector<8x12xf32>
    %4 = tpu.concatenate %1, %3 in 1 : vector<8x20xf32>, vector<8x12xf32> -> vector<8x32xf32>
    %c0_5 = arith.constant 0 : index
    %c0_6 = arith.constant 0 : index
    %c0_7 = arith.constant 0 : index
    %5 = vector.load %arg9[%c0_5, %c0_6, %c0_7] : memref<2x6x32xf32, #tpu.memory_space<vmem>>, vector<1x6x32xf32>
    %6 = vector.shape_cast %5 : vector<1x6x32xf32> to vector<6x32xf32>
    %7 = vector.shape_cast %4 : vector<8x32xf32> to vector<1x8x32xf32>
    %8 = vector.shape_cast %7 : vector<1x8x32xf32> to vector<1x8x32xf32>
    %9 = vector.broadcast %8 : vector<1x8x32xf32> to vector<4x8x32xf32>
    %c0_8 = arith.constant 0 : index
    %c0_9 = arith.constant 0 : index
    %c0_10 = arith.constant 0 : index
    %c0_11 = arith.constant 0 : index
    %10 = vector.load %arg3[%c0_8, %c0_9, %c0_10, %c0_11] : memref<2x4x32x24xf32, #tpu.memory_space<vmem>>, vector<1x4x32x24xf32>
    %11 = vector.shape_cast %10 : vector<1x4x32x24xf32> to vector<4x32x24xf32>
    "tpu.trace_start"() <{level = 10 : i32, message = "hld,hdk->hlk"}> : () -> ()
    %cst = arith.constant dense<0.000000e+00> : vector<4x8x24xf32>
    %12 = tpu.matmul %9, %11, %cst {dimension_numbers = #tpu.dot_dimension_numbers<[2], [1], [1], [2], [0, 0, 0, 1, 1, 2], [0], [0]>} : vector<4x8x32xf32>, vector<4x32x24xf32>, vector<4x8x24xf32> -> vector<4x8x24xf32>
    "tpu.trace_stop"() : () -> ()
    %c0_12 = arith.constant 0 : index
    %c0_13 = arith.constant 0 : index
    %c0_14 = arith.constant 0 : index
    %c0_15 = arith.constant 0 : index
    %13 = vector.load %arg4[%c0_12, %c0_13, %c0_14, %c0_15] : memref<2x4x1x24xf32, #tpu.memory_space<vmem>>, vector<1x4x1x24xf32>
    %14 = vector.shape_cast %13 : vector<1x4x1x24xf32> to vector<4x1x24xf32>
    %15 = vector.broadcast %14 : vector<4x1x24xf32> to vector<4x8x24xf32>
    %16 = arith.addf %12, %15 : vector<4x8x24xf32>
    %17 = vector.extract_strided_slice %16 {offsets = [0, 0, 0], sizes = [4, 8, 8], strides = [1, 1, 1]} : vector<4x8x24xf32> to vector<4x8x8xf32>
    %18 = vector.extract_strided_slice %16 {offsets = [0, 0, 8], sizes = [4, 8, 8], strides = [1, 1, 1]} : vector<4x8x24xf32> to vector<4x8x8xf32>
    %19 = vector.extract_strided_slice %16 {offsets = [0, 0, 16], sizes = [4, 8, 8], strides = [1, 1, 1]} : vector<4x8x24xf32> to vector<4x8x8xf32>
    "tpu.trace_start"() <{level = 10 : i32, message = "hqd,hkd->hqk"}> : () -> ()
    %cst_16 = arith.constant dense<0.000000e+00> : vector<4x8x8xf32>
    %20 = tpu.matmul %17, %18, %cst_16 {dimension_numbers = #tpu.dot_dimension_numbers<[2], [2], [1], [1], [0, 0, 0, 1, 1, 1], [0], [0]>} : vector<4x8x8xf32>, vector<4x8x8xf32>, vector<4x8x8xf32> -> vector<4x8x8xf32>
    "tpu.trace_stop"() : () -> ()
    %cst_17 = arith.constant 0.353553385 : f32
    %21 = vector.broadcast %cst_17 : f32 to vector<4x8x8xf32>
    %22 = arith.mulf %20, %21 : vector<4x8x8xf32>
    %cst_18 = arith.constant dense<0xFF800000> : vector<4x8xf32>
    %23 = vector.multi_reduction <maximumf>, %22, %cst_18 [2] : vector<4x8x8xf32> to vector<4x8xf32>
    %24 = vector.shape_cast %23 : vector<4x8xf32> to vector<4x8x1xf32>
    %25 = vector.broadcast %24 : vector<4x8x1xf32> to vector<4x8x8xf32>
    %26 = arith.subf %22, %25 : vector<4x8x8xf32>
    %27 = math.exp %26 : vector<4x8x8xf32>
    %cst_19 = arith.constant dense<0.000000e+00> : vector<4x8xf32>
    %28 = vector.multi_reduction <add>, %27, %cst_19 [2] : vector<4x8x8xf32> to vector<4x8xf32>
    %29 = vector.shape_cast %28 : vector<4x8xf32> to vector<4x8x1xf32>
    %30 = tpu.reciprocal %29 {approx = true} : vector<4x8x1xf32> -> vector<4x8x1xf32>
    %31 = vector.broadcast %30 : vector<4x8x1xf32> to vector<4x8x8xf32>
    %32 = arith.mulf %27, %31 : vector<4x8x8xf32>
    "tpu.trace_start"() <{level = 10 : i32, message = "hqk,hkd->hqd"}> : () -> ()
    %cst_20 = arith.constant dense<0.000000e+00> : vector<4x8x8xf32>
    %33 = tpu.matmul %32, %19, %cst_20 {dimension_numbers = #tpu.dot_dimension_numbers<[2], [1], [1], [2], [0, 0, 0, 1, 1, 2], [0], [0]>} : vector<4x8x8xf32>, vector<4x8x8xf32>, vector<4x8x8xf32> -> vector<4x8x8xf32>
    "tpu.trace_stop"() : () -> ()
    %c0_21 = arith.constant 0 : index
    %c0_22 = arith.constant 0 : index
    %c0_23 = arith.constant 0 : index
    %c0_24 = arith.constant 0 : index
    %34 = vector.load %arg5[%c0_21, %c0_22, %c0_23, %c0_24] : memref<2x4x8x32xf32, #tpu.memory_space<vmem>>, vector<1x4x8x32xf32>
    %35 = vector.shape_cast %34 : vector<1x4x8x32xf32> to vector<4x8x32xf32>
    "tpu.trace_start"() <{level = 10 : i32, message = "hld,hdo->hlo"}> : () -> ()
    %cst_25 = arith.constant dense<0.000000e+00> : vector<4x8x32xf32>
    %36 = tpu.matmul %33, %35, %cst_25 {dimension_numbers = #tpu.dot_dimension_numbers<[2], [1], [1], [2], [0, 0, 0, 1, 1, 2], [0], [0]>} : vector<4x8x8xf32>, vector<4x8x32xf32>, vector<4x8x32xf32> -> vector<4x8x32xf32>
    "tpu.trace_stop"() : () -> ()
    %cst_26 = arith.constant dense<0.000000e+00> : vector<8x32xf32>
    %37 = vector.multi_reduction <add>, %36, %cst_26 [0] : vector<4x8x32xf32> to vector<8x32xf32>
    %38 = vector.extract_strided_slice %6 {offsets = [0, 0], sizes = [1, 32], strides = [1, 1]} : vector<6x32xf32> to vector<1x32xf32>
    %39 = vector.broadcast %38 : vector<1x32xf32> to vector<8x32xf32>
    %40 = arith.addf %37, %39 : vector<8x32xf32>
    %41 = arith.addf %4, %40 : vector<8x32xf32>
    %42 = vector.extract_strided_slice %6 {offsets = [1, 0], sizes = [1, 32], strides = [1, 1]} : vector<6x32xf32> to vector<1x32xf32>
    %43 = vector.extract_strided_slice %6 {offsets = [2, 0], sizes = [1, 32], strides = [1, 1]} : vector<6x32xf32> to vector<1x32xf32>
    %cst_27 = arith.constant dense<0.000000e+00> : vector<8xf32>
    %44 = vector.multi_reduction <add>, %41, %cst_27 [1] : vector<8x32xf32> to vector<8xf32>
    %45 = vector.shape_cast %44 : vector<8xf32> to vector<8x1xf32>
    %cst_28 = arith.constant 3.200000e+01 : f32
    %46 = vector.broadcast %cst_28 : f32 to vector<8x1xf32>
    %47 = arith.divf %45, %46 : vector<8x1xf32>
    %48 = vector.broadcast %47 : vector<8x1xf32> to vector<8x32xf32>
    %49 = arith.subf %41, %48 : vector<8x32xf32>
    %50 = arith.mulf %49, %49 : vector<8x32xf32>
    %cst_29 = arith.constant dense<0.000000e+00> : vector<8xf32>
    %51 = vector.multi_reduction <add>, %50, %cst_29 [1] : vector<8x32xf32> to vector<8xf32>
    %52 = vector.shape_cast %51 : vector<8xf32> to vector<8x1xf32>
    %cst_30 = arith.constant 3.200000e+01 : f32
    %53 = vector.broadcast %cst_30 : f32 to vector<8x1xf32>
    %54 = arith.divf %52, %53 : vector<8x1xf32>
    %55 = vector.broadcast %47 : vector<8x1xf32> to vector<8x32xf32>
    %56 = arith.subf %41, %55 : vector<8x32xf32>
    %cst_31 = arith.constant 9.99999974E-6 : f32
    %57 = vector.broadcast %cst_31 : f32 to vector<8x1xf32>
    %58 = arith.addf %54, %57 : vector<8x1xf32>
    %59 = math.rsqrt %58 : vector<8x1xf32>
    %60 = vector.broadcast %59 : vector<8x1xf32> to vector<8x32xf32>
    %61 = arith.mulf %56, %60 : vector<8x32xf32>
    %62 = vector.broadcast %42 : vector<1x32xf32> to vector<8x32xf32>
    %63 = arith.mulf %61, %62 : vector<8x32xf32>
    %64 = vector.broadcast %43 : vector<1x32xf32> to vector<8x32xf32>
    %65 = arith.addf %63, %64 : vector<8x32xf32>
    %c0_32 = arith.constant 0 : index
    %c0_33 = arith.constant 0 : index
    %c0_34 = arith.constant 0 : index
    %66 = vector.load %arg6[%c0_32, %c0_33, %c0_34] : memref<2x32x64xf32, #tpu.memory_space<vmem>>, vector<1x32x64xf32>
    %67 = vector.shape_cast %66 : vector<1x32x64xf32> to vector<32x64xf32>
    %cst_35 = arith.constant dense<0.000000e+00> : vector<8x64xf32>
    %68 = tpu.matmul %65, %67, %cst_35 {dimension_numbers = #tpu.dot_dimension_numbers<[1], [0], [0], [1], [0, 0, 1, 1], [], []>} : vector<8x32xf32>, vector<32x64xf32>, vector<8x64xf32> -> vector<8x64xf32>
    %c0_36 = arith.constant 0 : index
    %c0_37 = arith.constant 0 : index
    %c0_38 = arith.constant 0 : index
    %69 = vector.load %arg7[%c0_36, %c0_37, %c0_38] : memref<2x1x64xf32, #tpu.memory_space<vmem>>, vector<1x1x64xf32>
    %70 = vector.shape_cast %69 : vector<1x1x64xf32> to vector<1x64xf32>
    %71 = vector.broadcast %70 : vector<1x64xf32> to vector<8x64xf32>
    %72 = arith.addf %68, %71 : vector<8x64xf32>
    %cst_39 = arith.constant 0.000000e+00 : f32
    %73 = vector.broadcast %cst_39 : f32 to vector<8x64xf32>
    %74 = arith.maximumf %72, %73 : vector<8x64xf32>
    %c0_40 = arith.constant 0 : index
    %c0_41 = arith.constant 0 : index
    %c0_42 = arith.constant 0 : index
    %75 = vector.load %arg8[%c0_40, %c0_41, %c0_42] : memref<2x64x32xf32, #tpu.memory_space<vmem>>, vector<1x64x32xf32>
    %76 = vector.shape_cast %75 : vector<1x64x32xf32> to vector<64x32xf32>
    %cst_43 = arith.constant dense<0.000000e+00> : vector<8x32xf32>
    %77 = tpu.matmul %74, %76, %cst_43 {dimension_numbers = #tpu.dot_dimension_numbers<[1], [0], [0], [1], [0, 0, 1, 1], [], []>} : vector<8x64xf32>, vector<64x32xf32>, vector<8x32xf32> -> vector<8x32xf32>
    %78 = vector.extract_strided_slice %6 {offsets = [3, 0], sizes = [1, 32], strides = [1, 1]} : vector<6x32xf32> to vector<1x32xf32>
    %79 = vector.broadcast %78 : vector<1x32xf32> to vector<8x32xf32>
    %80 = arith.addf %77, %79 : vector<8x32xf32>
    %81 = arith.addf %65, %80 : vector<8x32xf32>
    %82 = vector.extract_strided_slice %6 {offsets = [4, 0], sizes = [1, 32], strides = [1, 1]} : vector<6x32xf32> to vector<1x32xf32>
    %83 = vector.extract_strided_slice %6 {offsets = [5, 0], sizes = [1, 32], strides = [1, 1]} : vector<6x32xf32> to vector<1x32xf32>
    %cst_44 = arith.constant dense<0.000000e+00> : vector<8xf32>
    %84 = vector.multi_reduction <add>, %81, %cst_44 [1] : vector<8x32xf32> to vector<8xf32>
    %85 = vector.shape_cast %84 : vector<8xf32> to vector<8x1xf32>
    %cst_45 = arith.constant 3.200000e+01 : f32
    %86 = vector.broadcast %cst_45 : f32 to vector<8x1xf32>
    %87 = arith.divf %85, %86 : vector<8x1xf32>
    %88 = vector.broadcast %87 : vector<8x1xf32> to vector<8x32xf32>
    %89 = arith.subf %81, %88 : vector<8x32xf32>
    %90 = arith.mulf %89, %89 : vector<8x32xf32>
    %cst_46 = arith.constant dense<0.000000e+00> : vector<8xf32>
    %91 = vector.multi_reduction <add>, %90, %cst_46 [1] : vector<8x32xf32> to vector<8xf32>
    %92 = vector.shape_cast %91 : vector<8xf32> to vector<8x1xf32>
    %cst_47 = arith.constant 3.200000e+01 : f32
    %93 = vector.broadcast %cst_47 : f32 to vector<8x1xf32>
    %94 = arith.divf %92, %93 : vector<8x1xf32>
    %95 = vector.broadcast %87 : vector<8x1xf32> to vector<8x32xf32>
    %96 = arith.subf %81, %95 : vector<8x32xf32>
    %cst_48 = arith.constant 9.99999974E-6 : f32
    %97 = vector.broadcast %cst_48 : f32 to vector<8x1xf32>
    %98 = arith.addf %94, %97 : vector<8x1xf32>
    %99 = math.rsqrt %98 : vector<8x1xf32>
    %100 = vector.broadcast %99 : vector<8x1xf32> to vector<8x32xf32>
    %101 = arith.mulf %96, %100 : vector<8x32xf32>
    %102 = vector.broadcast %82 : vector<1x32xf32> to vector<8x32xf32>
    %103 = arith.mulf %101, %102 : vector<8x32xf32>
    %104 = vector.broadcast %83 : vector<1x32xf32> to vector<8x32xf32>
    %105 = arith.addf %103, %104 : vector<8x32xf32>
    %c1 = arith.constant 1 : index
    %c0_49 = arith.constant 0 : index
    %c0_50 = arith.constant 0 : index
    %106 = vector.load %arg9[%c1, %c0_49, %c0_50] : memref<2x6x32xf32, #tpu.memory_space<vmem>>, vector<1x6x32xf32>
    %107 = vector.shape_cast %106 : vector<1x6x32xf32> to vector<6x32xf32>
    %108 = vector.shape_cast %105 : vector<8x32xf32> to vector<1x8x32xf32>
    %109 = vector.shape_cast %108 : vector<1x8x32xf32> to vector<1x8x32xf32>
    %110 = vector.broadcast %109 : vector<1x8x32xf32> to vector<4x8x32xf32>
    %c1_51 = arith.constant 1 : index
    %c0_52 = arith.constant 0 : index
    %c0_53 = arith.constant 0 : index
    %c0_54 = arith.constant 0 : index
    %111 = vector.load %arg3[%c1_51, %c0_52, %c0_53, %c0_54] : memref<2x4x32x24xf32, #tpu.memory_space<vmem>>, vector<1x4x32x24xf32>
    %112 = vector.shape_cast %111 : vector<1x4x32x24xf32> to vector<4x32x24xf32>
    "tpu.trace_start"() <{level = 10 : i32, message = "hld,hdk->hlk"}> : () -> ()
    %cst_55 = arith.constant dense<0.000000e+00> : vector<4x8x24xf32>
    %113 = tpu.matmul %110, %112, %cst_55 {dimension_numbers = #tpu.dot_dimension_numbers<[2], [1], [1], [2], [0, 0, 0, 1, 1, 2], [0], [0]>} : vector<4x8x32xf32>, vector<4x32x24xf32>, vector<4x8x24xf32> -> vector<4x8x24xf32>
    "tpu.trace_stop"() : () -> ()
    %c1_56 = arith.constant 1 : index
    %c0_57 = arith.constant 0 : index
    %c0_58 = arith.constant 0 : index
    %c0_59 = arith.constant 0 : index
    %114 = vector.load %arg4[%c1_56, %c0_57, %c0_58, %c0_59] : memref<2x4x1x24xf32, #tpu.memory_space<vmem>>, vector<1x4x1x24xf32>
    %115 = vector.shape_cast %114 : vector<1x4x1x24xf32> to vector<4x1x24xf32>
    %116 = vector.broadcast %115 : vector<4x1x24xf32> to vector<4x8x24xf32>
    %117 = arith.addf %113, %116 : vector<4x8x24xf32>
    %118 = vector.extract_strided_slice %117 {offsets = [0, 0, 0], sizes = [4, 8, 8], strides = [1, 1, 1]} : vector<4x8x24xf32> to vector<4x8x8xf32>
    %119 = vector.extract_strided_slice %117 {offsets = [0, 0, 8], sizes = [4, 8, 8], strides = [1, 1, 1]} : vector<4x8x24xf32> to vector<4x8x8xf32>
    %120 = vector.extract_strided_slice %117 {offsets = [0, 0, 16], sizes = [4, 8, 8], strides = [1, 1, 1]} : vector<4x8x24xf32> to vector<4x8x8xf32>
    "tpu.trace_start"() <{level = 10 : i32, message = "hqd,hkd->hqk"}> : () -> ()
    %cst_60 = arith.constant dense<0.000000e+00> : vector<4x8x8xf32>
    %121 = tpu.matmul %118, %119, %cst_60 {dimension_numbers = #tpu.dot_dimension_numbers<[2], [2], [1], [1], [0, 0, 0, 1, 1, 1], [0], [0]>} : vector<4x8x8xf32>, vector<4x8x8xf32>, vector<4x8x8xf32> -> vector<4x8x8xf32>
    "tpu.trace_stop"() : () -> ()
    %cst_61 = arith.constant 0.353553385 : f32
    %122 = vector.broadcast %cst_61 : f32 to vector<4x8x8xf32>
    %123 = arith.mulf %121, %122 : vector<4x8x8xf32>
    %cst_62 = arith.constant dense<0xFF800000> : vector<4x8xf32>
    %124 = vector.multi_reduction <maximumf>, %123, %cst_62 [2] : vector<4x8x8xf32> to vector<4x8xf32>
    %125 = vector.shape_cast %124 : vector<4x8xf32> to vector<4x8x1xf32>
    %126 = vector.broadcast %125 : vector<4x8x1xf32> to vector<4x8x8xf32>
    %127 = arith.subf %123, %126 : vector<4x8x8xf32>
    %128 = math.exp %127 : vector<4x8x8xf32>
    %cst_63 = arith.constant dense<0.000000e+00> : vector<4x8xf32>
    %129 = vector.multi_reduction <add>, %128, %cst_63 [2] : vector<4x8x8xf32> to vector<4x8xf32>
    %130 = vector.shape_cast %129 : vector<4x8xf32> to vector<4x8x1xf32>
    %131 = tpu.reciprocal %130 {approx = true} : vector<4x8x1xf32> -> vector<4x8x1xf32>
    %132 = vector.broadcast %131 : vector<4x8x1xf32> to vector<4x8x8xf32>
    %133 = arith.mulf %128, %132 : vector<4x8x8xf32>
    "tpu.trace_start"() <{level = 10 : i32, message = "hqk,hkd->hqd"}> : () -> ()
    %cst_64 = arith.constant dense<0.000000e+00> : vector<4x8x8xf32>
    %134 = tpu.matmul %133, %120, %cst_64 {dimension_numbers = #tpu.dot_dimension_numbers<[2], [1], [1], [2], [0, 0, 0, 1, 1, 2], [0], [0]>} : vector<4x8x8xf32>, vector<4x8x8xf32>, vector<4x8x8xf32> -> vector<4x8x8xf32>
    "tpu.trace_stop"() : () -> ()
    %c1_65 = arith.constant 1 : index
    %c0_66 = arith.constant 0 : index
    %c0_67 = arith.constant 0 : index
    %c0_68 = arith.constant 0 : index
    %135 = vector.load %arg5[%c1_65, %c0_66, %c0_67, %c0_68] : memref<2x4x8x32xf32, #tpu.memory_space<vmem>>, vector<1x4x8x32xf32>
    %136 = vector.shape_cast %135 : vector<1x4x8x32xf32> to vector<4x8x32xf32>
    "tpu.trace_start"() <{level = 10 : i32, message = "hld,hdo->hlo"}> : () -> ()
    %cst_69 = arith.constant dense<0.000000e+00> : vector<4x8x32xf32>
    %137 = tpu.matmul %134, %136, %cst_69 {dimension_numbers = #tpu.dot_dimension_numbers<[2], [1], [1], [2], [0, 0, 0, 1, 1, 2], [0], [0]>} : vector<4x8x8xf32>, vector<4x8x32xf32>, vector<4x8x32xf32> -> vector<4x8x32xf32>
    "tpu.trace_stop"() : () -> ()
    %cst_70 = arith.constant dense<0.000000e+00> : vector<8x32xf32>
    %138 = vector.multi_reduction <add>, %137, %cst_70 [0] : vector<4x8x32xf32> to vector<8x32xf32>
    %139 = vector.extract_strided_slice %107 {offsets = [0, 0], sizes = [1, 32], strides = [1, 1]} : vector<6x32xf32> to vector<1x32xf32>
    %140 = vector.broadcast %139 : vector<1x32xf32> to vector<8x32xf32>
    %141 = arith.addf %138, %140 : vector<8x32xf32>
    %142 = arith.addf %105, %141 : vector<8x32xf32>
    %143 = vector.extract_strided_slice %107 {offsets = [1, 0], sizes = [1, 32], strides = [1, 1]} : vector<6x32xf32> to vector<1x32xf32>
    %144 = vector.extract_strided_slice %107 {offsets = [2, 0], sizes = [1, 32], strides = [1, 1]} : vector<6x32xf32> to vector<1x32xf32>
    %cst_71 = arith.constant dense<0.000000e+00> : vector<8xf32>
    %145 = vector.multi_reduction <add>, %142, %cst_71 [1] : vector<8x32xf32> to vector<8xf32>
    %146 = vector.shape_cast %145 : vector<8xf32> to vector<8x1xf32>
    %cst_72 = arith.constant 3.200000e+01 : f32
    %147 = vector.broadcast %cst_72 : f32 to vector<8x1xf32>
    %148 = arith.divf %146, %147 : vector<8x1xf32>
    %149 = vector.broadcast %148 : vector<8x1xf32> to vector<8x32xf32>
    %150 = arith.subf %142, %149 : vector<8x32xf32>
    %151 = arith.mulf %150, %150 : vector<8x32xf32>
    %cst_73 = arith.constant dense<0.000000e+00> : vector<8xf32>
    %152 = vector.multi_reduction <add>, %151, %cst_73 [1] : vector<8x32xf32> to vector<8xf32>
    %153 = vector.shape_cast %152 : vector<8xf32> to vector<8x1xf32>
    %cst_74 = arith.constant 3.200000e+01 : f32
    %154 = vector.broadcast %cst_74 : f32 to vector<8x1xf32>
    %155 = arith.divf %153, %154 : vector<8x1xf32>
    %156 = vector.broadcast %148 : vector<8x1xf32> to vector<8x32xf32>
    %157 = arith.subf %142, %156 : vector<8x32xf32>
    %cst_75 = arith.constant 9.99999974E-6 : f32
    %158 = vector.broadcast %cst_75 : f32 to vector<8x1xf32>
    %159 = arith.addf %155, %158 : vector<8x1xf32>
    %160 = math.rsqrt %159 : vector<8x1xf32>
    %161 = vector.broadcast %160 : vector<8x1xf32> to vector<8x32xf32>
    %162 = arith.mulf %157, %161 : vector<8x32xf32>
    %163 = vector.broadcast %143 : vector<1x32xf32> to vector<8x32xf32>
    %164 = arith.mulf %162, %163 : vector<8x32xf32>
    %165 = vector.broadcast %144 : vector<1x32xf32> to vector<8x32xf32>
    %166 = arith.addf %164, %165 : vector<8x32xf32>
    %c1_76 = arith.constant 1 : index
    %c0_77 = arith.constant 0 : index
    %c0_78 = arith.constant 0 : index
    %167 = vector.load %arg6[%c1_76, %c0_77, %c0_78] : memref<2x32x64xf32, #tpu.memory_space<vmem>>, vector<1x32x64xf32>
    %168 = vector.shape_cast %167 : vector<1x32x64xf32> to vector<32x64xf32>
    %cst_79 = arith.constant dense<0.000000e+00> : vector<8x64xf32>
    %169 = tpu.matmul %166, %168, %cst_79 {dimension_numbers = #tpu.dot_dimension_numbers<[1], [0], [0], [1], [0, 0, 1, 1], [], []>} : vector<8x32xf32>, vector<32x64xf32>, vector<8x64xf32> -> vector<8x64xf32>
    %c1_80 = arith.constant 1 : index
    %c0_81 = arith.constant 0 : index
    %c0_82 = arith.constant 0 : index
    %170 = vector.load %arg7[%c1_80, %c0_81, %c0_82] : memref<2x1x64xf32, #tpu.memory_space<vmem>>, vector<1x1x64xf32>
    %171 = vector.shape_cast %170 : vector<1x1x64xf32> to vector<1x64xf32>
    %172 = vector.broadcast %171 : vector<1x64xf32> to vector<8x64xf32>
    %173 = arith.addf %169, %172 : vector<8x64xf32>
    %cst_83 = arith.constant 0.000000e+00 : f32
    %174 = vector.broadcast %cst_83 : f32 to vector<8x64xf32>
    %175 = arith.maximumf %173, %174 : vector<8x64xf32>
    %c1_84 = arith.constant 1 : index
    %c0_85 = arith.constant 0 : index
    %c0_86 = arith.constant 0 : index
    %176 = vector.load %arg8[%c1_84, %c0_85, %c0_86] : memref<2x64x32xf32, #tpu.memory_space<vmem>>, vector<1x64x32xf32>
    %177 = vector.shape_cast %176 : vector<1x64x32xf32> to vector<64x32xf32>
    %cst_87 = arith.constant dense<0.000000e+00> : vector<8x32xf32>
    %178 = tpu.matmul %175, %177, %cst_87 {dimension_numbers = #tpu.dot_dimension_numbers<[1], [0], [0], [1], [0, 0, 1, 1], [], []>} : vector<8x64xf32>, vector<64x32xf32>, vector<8x32xf32> -> vector<8x32xf32>
    %179 = vector.extract_strided_slice %107 {offsets = [3, 0], sizes = [1, 32], strides = [1, 1]} : vector<6x32xf32> to vector<1x32xf32>
    %180 = vector.broadcast %179 : vector<1x32xf32> to vector<8x32xf32>
    %181 = arith.addf %178, %180 : vector<8x32xf32>
    %182 = arith.addf %166, %181 : vector<8x32xf32>
    %183 = vector.extract_strided_slice %107 {offsets = [4, 0], sizes = [1, 32], strides = [1, 1]} : vector<6x32xf32> to vector<1x32xf32>
    %184 = vector.extract_strided_slice %107 {offsets = [5, 0], sizes = [1, 32], strides = [1, 1]} : vector<6x32xf32> to vector<1x32xf32>
    %cst_88 = arith.constant dense<0.000000e+00> : vector<8xf32>
    %185 = vector.multi_reduction <add>, %182, %cst_88 [1] : vector<8x32xf32> to vector<8xf32>
    %186 = vector.shape_cast %185 : vector<8xf32> to vector<8x1xf32>
    %cst_89 = arith.constant 3.200000e+01 : f32
    %187 = vector.broadcast %cst_89 : f32 to vector<8x1xf32>
    %188 = arith.divf %186, %187 : vector<8x1xf32>
    %189 = vector.broadcast %188 : vector<8x1xf32> to vector<8x32xf32>
    %190 = arith.subf %182, %189 : vector<8x32xf32>
    %191 = arith.mulf %190, %190 : vector<8x32xf32>
    %cst_90 = arith.constant dense<0.000000e+00> : vector<8xf32>
    %192 = vector.multi_reduction <add>, %191, %cst_90 [1] : vector<8x32xf32> to vector<8xf32>
    %193 = vector.shape_cast %192 : vector<8xf32> to vector<8x1xf32>
    %cst_91 = arith.constant 3.200000e+01 : f32
    %194 = vector.broadcast %cst_91 : f32 to vector<8x1xf32>
    %195 = arith.divf %193, %194 : vector<8x1xf32>
    %196 = vector.broadcast %188 : vector<8x1xf32> to vector<8x32xf32>
    %197 = arith.subf %182, %196 : vector<8x32xf32>
    %cst_92 = arith.constant 9.99999974E-6 : f32
    %198 = vector.broadcast %cst_92 : f32 to vector<8x1xf32>
    %199 = arith.addf %195, %198 : vector<8x1xf32>
    %200 = math.rsqrt %199 : vector<8x1xf32>
    %201 = vector.broadcast %200 : vector<8x1xf32> to vector<8x32xf32>
    %202 = arith.mulf %197, %201 : vector<8x32xf32>
    %203 = vector.broadcast %183 : vector<1x32xf32> to vector<8x32xf32>
    %204 = arith.mulf %202, %203 : vector<8x32xf32>
    %205 = vector.broadcast %184 : vector<1x32xf32> to vector<8x32xf32>
    %206 = arith.addf %204, %205 : vector<8x32xf32>
    %c0_93 = arith.constant 0 : index
    %c0_94 = arith.constant 0 : index
    %207 = vector.load %arg10[%c0_93, %c0_94] : memref<32x2xf32, #tpu.memory_space<vmem>>, vector<32x2xf32>
    %cst_95 = arith.constant dense<0.000000e+00> : vector<8x2xf32>
    %208 = tpu.matmul %206, %207, %cst_95 {dimension_numbers = #tpu.dot_dimension_numbers<[1], [0], [0], [1], [0, 0, 1, 1], [], []>} : vector<8x32xf32>, vector<32x2xf32>, vector<8x2xf32> -> vector<8x2xf32>
    %c0_96 = arith.constant 0 : index
    %c0_97 = arith.constant 0 : index
    %209 = vector.load %arg11[%c0_96, %c0_97] : memref<1x2xf32, #tpu.memory_space<vmem>>, vector<1x2xf32>
    %210 = vector.broadcast %209 : vector<1x2xf32> to vector<8x2xf32>
    %211 = arith.addf %208, %210 : vector<8x2xf32>
    %c0_98 = arith.constant 0 : index
    %c0_99 = arith.constant 0 : index
    %c0_100 = arith.constant 0 : index
    %212 = vector.load %arg12[%c0_98, %c0_99, %c0_100] : memref<1x8x2xf32, #tpu.memory_space<vmem>>, vector<1x8x2xf32>
    %213 = vector.shape_cast %212 : vector<1x8x2xf32> to vector<8x2xf32>
    %214 = vector.shape_cast %211 : vector<8x2xf32> to vector<1x8x2xf32>
    tpu.vector_store %arg12[%c0_98, %c0_99, %c0_100], %214 {strides = array<i32>} : memref<1x8x2xf32, #tpu.memory_space<vmem>>, vector<1x8x2xf32>,
    return
  }
  func.func @transform_0(%arg0: i32) -> (i32, i32, i32) {
    %c0_i32 = arith.constant 0 : i32
    %c0_i32_0 = arith.constant 0 : i32
    %c0_i32_1 = arith.constant 0 : i32
    return %arg0, %c0_i32, %c0_i32_0 : i32, i32, i32
  }
  func.func @transform_1(%arg0: i32) -> (i32, i32, i32) {
    %c0_i32 = arith.constant 0 : i32
    %c0_i32_0 = arith.constant 0 : i32
    %c0_i32_1 = arith.constant 0 : i32
    return %arg0, %c0_i32, %c0_i32_0 : i32, i32, i32
  }
  func.func @transform_2(%arg0: i32) -> (i32, i32, i32, i32) {
    %c0_i32 = arith.constant 0 : i32
    %c0_i32_0 = arith.constant 0 : i32
    %c0_i32_1 = arith.constant 0 : i32
    %c0_i32_2 = arith.constant 0 : i32
    %c0_i32_3 = arith.constant 0 : i32
    return %c0_i32, %c0_i32_0, %c0_i32_1, %c0_i32_2 : i32, i32, i32, i32
  }
  func.func @transform_3(%arg0: i32) -> (i32, i32, i32, i32) {
    %c0_i32 = arith.constant 0 : i32
    %c0_i32_0 = arith.constant 0 : i32
    %c0_i32_1 = arith.constant 0 : i32
    %c0_i32_2 = arith.constant 0 : i32
    %c0_i32_3 = arith.constant 0 : i32
    return %c0_i32, %c0_i32_0, %c0_i32_1, %c0_i32_2 : i32, i32, i32, i32
  }
  func.func @transform_4(%arg0: i32) -> (i32, i32, i32, i32) {
    %c0_i32 = arith.constant 0 : i32
    %c0_i32_0 = arith.constant 0 : i32
    %c0_i32_1 = arith.constant 0 : i32
    %c0_i32_2 = arith.constant 0 : i32
    %c0_i32_3 = arith.constant 0 : i32
    return %c0_i32, %c0_i32_0, %c0_i32_1, %c0_i32_2 : i32, i32, i32, i32
  }
  func.func @transform_5(%arg0: i32) -> (i32, i32, i32) {
    %c0_i32 = arith.constant 0 : i32
    %c0_i32_0 = arith.constant 0 : i32
    %c0_i32_1 = arith.constant 0 : i32
    %c0_i32_2 = arith.constant 0 : i32
    return %c0_i32, %c0_i32_0, %c0_i32_1 : i32, i32, i32
  }
  func.func @transform_6(%arg0: i32) -> (i32, i32, i32) {
    %c0_i32 = arith.constant 0 : i32
    %c0_i32_0 = arith.constant 0 : i32
    %c0_i32_1 = arith.constant 0 : i32
    %c0_i32_2 = arith.constant 0 : i32
    return %c0_i32, %c0_i32_0, %c0_i32_1 : i32, i32, i32
  }
  func.func @transform_7(%arg0: i32) -> (i32, i32, i32) {
    %c0_i32 = arith.constant 0 : i32
    %c0_i32_0 = arith.constant 0 : i32
    %c0_i32_1 = arith.constant 0 : i32
    %c0_i32_2 = arith.constant 0 : i32
    return %c0_i32, %c0_i32_0, %c0_i32_1 : i32, i32, i32
  }
  func.func @transform_8(%arg0: i32) -> (i32, i32, i32) {
    %c0_i32 = arith.constant 0 : i32
    %c0_i32_0 = arith.constant 0 : i32
    %c0_i32_1 = arith.constant 0 : i32
    %c0_i32_2 = arith.constant 0 : i32
    return %c0_i32, %c0_i32_0, %c0_i32_1 : i32, i32, i32
  }
  func.func @transform_9(%arg0: i32) -> (i32, i32) {
    %c0_i32 = arith.constant 0 : i32
    %c0_i32_0 = arith.constant 0 : i32
    %c0_i32_1 = arith.constant 0 : i32
    return %c0_i32, %c0_i32_0 : i32, i32
  }
  func.func @transform_10(%arg0: i32) -> (i32, i32) {
    %c0_i32 = arith.constant 0 : i32
    %c0_i32_0 = arith.constant 0 : i32
    %c0_i32_1 = arith.constant 0 : i32
    return %c0_i32, %c0_i32_0 : i32, i32
  }
  func.func @transform_11(%arg0: i32) -> (i32, i32, i32) {
    %c0_i32 = arith.constant 0 : i32
    %c0_i32_0 = arith.constant 0 : i32
    %c0_i32_1 = arith.constant 0 : i32
    return %arg0, %c0_i32, %c0_i32_0 : i32, i32, i32
  }
}

</mosaic_0001>

<bundles_post_ra>
// kernel: tpu_custom_call.1
= control target key start
LH: loop header
LB: loop body
LE: loop exit
PB: predicated region body
PF: predicated region fallthrough
CT: control target
= control target key end

     0   :  { %s4227_s17 = smov 0   ;;  %s4828_s0 = inlined_call_operand.vmem [shape: f32[2,8,20], index: 0, kind: input, shape index: {}]   ;;  %s4829_s1 = inlined_call_operand.vmem [shape: f32[2,8,12], index: 1, kind: input, shape index: {}]   ;;  %s4830_s2 = inlined_call_operand.vmem [shape: f32[2,4,32,24], index: 2, kind: input, shape index: {}]   ;;  %s4831_s3 = inlined_call_operand.vmem [shape: f32[2,4,1,24], index: 3, kind: input, shape index: {}]   ;;  %s4832_s4 = inlined_call_operand.vmem [shape: f32[2,4,8,32], index: 4, kind: input, shape index: {}]   ;;  %s4833_s5 = inlined_call_operand.vmem [shape: f32[2,32,64], index: 5, kind: input, shape index: {}]   ;;  %s4834_s6 = inlined_call_operand.vmem [shape: f32[2,1,64], index: 6, kind: input, shape index: {}]   ;;  %s4835_s7 = inlined_call_operand.vmem [shape: f32[2,64,32], index: 7, kind: input, shape index: {}]   ;;  %s4836_s8 = inlined_call_operand.vmem [shape: f32[2,6,32], index: 8, kind: input, shape index: {}]   ;;  %s4837_s9 = inlined_call_operand.vmem [shape: f32[32,2], index: 9, kind: input, shape index: {}]   ;;  %s4838_s10 = inlined_call_operand.vmem [shape: f32[1,2], index: 10, kind: input, shape index: {}]   ;;  %s4839_s11 = inlined_call_operand.vmem [shape: f32[2,8,2], index: 11, kind: output, shape index: {}]  }
   0x1 LB: > { %s3597_s18 = sadd.s32 4294967295, %s4160_s17   ;;  %p3601_p0 = scmp.ge.s32.totalorder %s4160_s17, 1  ;;  %s4160_s17 = sphi %s4227_s17, %s21_s17  }
   0x2   : > { %p345_p1 = scmp.lt.s32.totalorder %s4160_s17, 3 }
   0x4   : > { %p346_p2 = pnand %p3601_p0, %p345_p1 }
   0x5   : > { %p387_p3 = scmp.lt.s32.totalorder (!%p346_p2), %s3597_s18, 1  ;;  %s4163_s21 = smov (!%p346_p2), 20  }
   0x6   : > { %349 = sbr.rel (%p346_p2) target bundleno = 4804 (0x12c4), region = 64  ;;  %s4165_s28 = smov (!%p346_p2), 120  }
   0xb   : > { %v411_v0 = vld [vmem:[%s4830_s2 + $0x18] sm:$0xff]  ;;  %v4162_v2 = vmov 0.0   ;;  %v410_v3 = vld [vmem:[%s4830_s2 + $0x10] sm:$0xff]  ;;  %s4841_s18 = smov (!%p387_p3, %s3597_s18), 1  ;;  %v409_v5 = vld [vmem:[%s4830_s2 + $0x8] sm:$0xff]  ;;  %vm4164_vm0 = vmmov 0  }
   0xc   : > { %v415_v1 = vld [vmem:[%s4830_s2 + $0x38] sm:$0xff]  ;;  %3822 = vmatprep.subr.mxu0 %v4162_v2  ;;  %3833 = vmatprep.subr.mxu1 %v4162_v2  ;;  %v414_v4 = vld [vmem:[%s4830_s2 + $0x30] sm:$0xff]  ;;  %v413_v6 = vld [vmem:[%s4830_s2 + $0x28] sm:$0xff]  ;;  %s4257_s12 = sshll.u32 %s4841_s18, 3  ;;  %vm405_vm1 = vcmask 162816   ;;  %vm452_vm2 = vcmask 261120  }
   0xd   : > { %3823 = vmatpush3.msra.mxu0 %v411_v0  ;;  %3834 = vmatpush3.msra.mxu1 %v415_v1  ;;  %s394_s15 = scalar_lea.vmem %s4829_s1, %s4257_s12  ;;  %v408_v7 = vld [vmem:[%s4830_s2] sm:$0xff]  ;;  %s390_s24 = scalar_lea.vmem %s4828_s0, %s4257_s12  ;;  %v419_v12 = vld [vmem:[%s4830_s2 + $0x58] sm:$0xff]  ;;  %v418_v15 = vld [vmem:[%s4830_s2 + $0x50] sm:$0xff]  ;;  %vm739_vm3 = vcmask 64512   ;;  %vm1827_vm4 = vcmask 523264   ;;  %vm3530_vm5 = vcmask 15360  }
   0xe   : > { %3824 = vmatprep.subr.mxu0 %v4162_v2  ;;  %3835 = vmatprep.subr.mxu1 %v4162_v2  ;;  %v400_v8 = vld [vmem:[%s394_s15] sm:$0xff]  ;;  %v423_v13 = vld [vmem:[%s4830_s2 + $0x78] sm:$0xff]  ;;  %v422_v16 = vld [vmem:[%s4830_s2 + $0x70] sm:$0xff]  ;;  %s4166_s15 = smov 112   ;;  %s398_s13 = scalar_lea.vmem %s4839_s11, %s4257_s12 }
   0xf   : > { %3825 = vmatpush3.msra.mxu0 %v410_v3  ;;  %3836 = vmatpush3.msra.mxu1 %v414_v4  ;;  %v412_v9 = vld [vmem:[%s4830_s2 + $0x20] sm:$0xff]  ;;  %v417_v17 = vld [vmem:[%s4830_s2 + $0x48] sm:$0xff] }
  0x10   : > { %3826 = vmatprep.subr.mxu0 %v4162_v2  ;;  %3837 = vmatprep.subr.mxu1 %v4162_v2  ;;  %v399_v10 = vld [vmem:[%s390_s24] sm:$0xff]  ;;  %v421_v18 = vld [vmem:[%s4830_s2 + $0x68] sm:$0xff] }
  0x11   : > { %3827 = vmatpush3.msra.mxu0 %v409_v5  ;;  %3838 = vmatpush3.msra.mxu1 %v413_v6  ;;  %v416_v19 = vld [vmem:[%s4830_s2 + $0x40] sm:$0xff] }
  0x12   : > { %402 = vrot.lane.b32.xlu0 %v400_v8, %s4163_s21  ;;  %3828 = vmatprep.subr.mxu0 %v4162_v2  ;;  %v420_v20 = vld [vmem:[%s4830_s2 + $0x60] sm:$0xff] }
  0x13   : > { %3839 = vmatprep.subr.mxu1 %v4162_v2  ;;  %3829 = vmatpush3.msra.mxu0 %v408_v7  ;;  %v3605_v21 = vld [vmem:[%s4831_s3] ss:$0 sm:$0xff]  ;;  %v3606_v22 = vld [vmem:[%s4831_s3 + $0x1] ss:$0 sm:$0xff]  ;;  %v3607_v29 = vld [vmem:[%s4831_s3 + $0x2] ss:$0 sm:$0xff] }
  0x14   : > { %3840 = vmatpush3.msra.mxu1 %v412_v9  ;;  %3830 = vmatprep.mubr.msk.f32.mxu0 %vm4164_vm0, %v4162_v2  ;;  %v3608_v30 = vld [vmem:[%s4831_s3 + $0x3] ss:$0 sm:$0xff] }
  0x15   : > { %3841 = vmatprep.mubr.msk.f32.mxu1 %vm4164_vm0, %v4162_v2  ;;  %3844 = vmatprep.subr.mxu0 %v4162_v2 }
  0x16   : > { %3855 = vmatprep.subr.mxu1 %v4162_v2 }
  0x84   : > { %v403_v11 = vpop.permute.xlu0 %402 }
  0x85   : > { %v4289_v14 = vsel %vm405_vm1, %v399_v10, %v403_v11 }
  0x86   : > { %3831 = vmatmul.mubr.msk.f32.vlgmr.msra.gmra.mxu0 %vm452_vm2, %v4289_v14  ;;  %3842 = vmatmul.mubr.msk.f32.vlgmr.msra.gmra.mxu1 %vm452_vm2, %v4289_v14 }
  0x87   : > { %3845 = vmatpush3.msra.mxu0 %v419_v12  ;;  %3856 = vmatpush3.msra.mxu1 %v423_v13 }
  0x88   : > { %3846 = vmatprep.subr.mxu0 %v4162_v2  ;;  %3857 = vmatprep.subr.mxu1 %v4162_v2 }
  0x89   : > { %3847 = vmatpush3.msra.mxu0 %v418_v15  ;;  %3858 = vmatpush3.msra.mxu1 %v422_v16 }
  0x8a   : > { %3848 = vmatprep.subr.mxu0 %v4162_v2  ;;  %3859 = vmatprep.subr.mxu1 %v4162_v2 }
  0x8b   : > { %3849 = vmatpush3.msra.mxu0 %v417_v17  ;;  %3860 = vmatpush3.msra.mxu1 %v421_v18 }
  0x8c   : > { %3850 = vmatprep.subr.mxu0 %v4162_v2  ;;  %3861 = vmatprep.subr.mxu1 %v4162_v2 }
  0x8d   : > { %3851 = vmatpush3.msra.mxu0 %v416_v19  ;;  %3852 = vmatprep.mubr.msk.f32.mxu0 %vm4164_vm0, %v4162_v2 }
  0x8e   : > { %3862 = vmatpush3.msra.mxu1 %v420_v20  ;;  %3863 = vmatprep.mubr.msk.f32.mxu1 %vm4164_vm0, %v4162_v2 }
  0x8f   : > { %3853 = vmatmul.mubr.msk.f32.vlgmr.msra.gmra.mxu0 %vm452_vm2, %v4289_v14  ;;  %3864 = vmatmul.mubr.msk.f32.vlgmr.msra.gmra.mxu1 %vm452_vm2, %v4289_v14 }
  0x90   : > { %3871 = vmatprep.subr.mxu1 %v4162_v2  ;;  %3866 = vmatprep.subr.mxu0 %v4162_v2 }
  0x91   : > { %3868 = vmatprep.mubr.msk.f32.mxu0 %vm4164_vm0, %v4162_v2  ;;  %3873 = vmatprep.mubr.msk.f32.mxu1 %vm4164_vm0, %v4162_v2 }
 0x146   : > { %v522_v23 = vpop.f32.mrf.mxu0  ;;  %v592_v24 = vpop.f32.mrf.mxu1 }
 0x147   : > { %v523_v25 = vadd.f32 %v3605_v21, %v522_v23  ;;  %v593_v26 = vadd.f32 %v3606_v22, %v592_v24 }
 0x148   : > { %v3832_v27 = vpop.f32.mrf.mxu0  ;;  %v3843_v28 = vpop.f32.mrf.mxu1 }
 0x149   : > { %815 = vrot.lane.b32.xlu1 %v593_v26, %s4165_s28  ;;  %737 = vrot.lane.b32.xlu0 %v523_v25, %s4165_s28 }
 0x14f   : > { %v662_v31 = vpop.f32.mrf.mxu0  ;;  %v732_v32 = vpop.f32.mrf.mxu1 }
 0x150   : > { %v4347_v33 = vadd.f32 %v3607_v29, %v662_v31  ;;  %v4349_v34 = vadd.f32 %v3608_v30, %v732_v32  ;;  %v1397_v31 = vld [vmem:[%s4832_s4] sm:$0xff]  ;;  %v1398_v32 = vld [vmem:[%s4832_s4 + $0x8] sm:$0xff] }
 0x151   : > { %v3854_v35 = vpop.f32.mrf.mxu0  ;;  %v3865_v36 = vpop.f32.mrf.mxu1 }
 0x152   : > { %969 = vrot.lane.b32.xlu0 %v4349_v34, %s4165_s28  ;;  %892 = vrot.lane.b32.xlu1 %v4347_v33, %s4165_s28  ;;  %v1399_v35 = vld [vmem:[%s4832_s4 + $0x10] sm:$0xff] }
 0x1bb   : > { %v816_v37 = vpop.permute.xlu1 %815  ;;  %v738_v38 = vpop.permute.xlu0 %737 }
 0x1bc   : > { %3867 = vmatpush3.xpose.msk.msra.mxu0 %vm739_vm3, %v738_v38  ;;  %3872 = vmatpush3.xpose.msk.msra.mxu1 %vm739_vm3, %v816_v37 }
 0x1bd   : > { %3876 = vmatprep.subr.mxu0 %v4162_v2  ;;  %3881 = vmatprep.subr.mxu1 %v4162_v2 }
 0x1bf   : > { %3869 = vmatmul.mubr.msk.f32.vlgmr.msra.gmra.mxu0 %vm739_vm3, %v523_v25  ;;  %3874 = vmatmul.mubr.msk.f32.vlgmr.msra.gmra.mxu1 %vm739_vm3, %v593_v26 }
 0x1c0   : > { %3878 = vmatprep.mubr.msk.f32.mxu0 %vm4164_vm0, %v4162_v2  ;;  %3883 = vmatprep.mubr.msk.f32.mxu1 %vm4164_vm0, %v4162_v2 }
 0x1c4   : > { %v970_v39 = vpop.permute.xlu0 %969  ;;  %v893_v40 = vpop.permute.xlu1 %892 }
 0x1c5   : > { %3877 = vmatpush3.xpose.msk.msra.mxu0 %vm739_vm3, %v893_v40  ;;  %3882 = vmatpush3.xpose.msk.msra.mxu1 %vm739_vm3, %v970_v39 }
 0x1c6   : > { %3886 = vmatprep.subr.mxu0 %v4162_v2  ;;  %3891 = vmatprep.subr.mxu1 %v4162_v2 }
 0x1c8   : > { %3879 = vmatmul.mubr.msk.f32.vlgmr.msra.gmra.mxu0 %vm739_vm3, %v4347_v33  ;;  %3884 = vmatmul.mubr.msk.f32.vlgmr.msra.gmra.mxu1 %vm739_vm3, %v4349_v34 }
 0x1c9   : > { %3888 = vmatprep.mubr.msk.f32.mxu0 %vm4164_vm0, %v4162_v2  ;;  %3893 = vmatprep.mubr.msk.f32.mxu1 %vm4164_vm0, %v4162_v2 }
 0x27f   : > { %v810_v41 = vpop.f32.mrf.mxu0  ;;  %v887_v42 = vpop.f32.mrf.mxu1 }
 0x280   : > { %v1045_v43 = vmul.f32 0.35355338, %v810_v41  ;;  %v1046_v44 = vmul.f32 0.35355338, %v887_v42 }
 0x281   : > { %v3870_v45 = vpop.f32.mrf.mxu0  ;;  %v3875_v46 = vpop.f32.mrf.mxu1 }
 0x282   : > { %v1052_v47 = vsel %vm739_vm3, %v1046_v44, -inf  ;;  %v1049_v48 = vsel %vm739_vm3, %v1045_v43, -inf }
 0x283   : > { %1053 = vmax.xlane.f32.xlu0 %v1052_v47  ;;  %1050 = vmax.xlane.f32.xlu1 %v1049_v48 }
 0x288   : > { %v964_v49 = vpop.f32.mrf.mxu0  ;;  %v1041_v50 = vpop.f32.mrf.mxu1 }
 0x289   : > { %v1047_v51 = vmul.f32 0.35355338, %v964_v49  ;;  %v1048_v52 = vmul.f32 0.35355338, %v1041_v50 }
 0x28a   : > { %v3880_v53 = vpop.f32.mrf.mxu0  ;;  %v3885_v54 = vpop.f32.mrf.mxu1 }
 0x28b   : > { %v1058_v55 = vsel %vm739_vm3, %v1048_v52, -inf  ;;  %v1055_v56 = vsel %vm739_vm3, %v1047_v51, -inf }
 0x28c   : > { %1059 = vmax.xlane.f32.xlu1 %v1058_v55  ;;  %1056 = vmax.xlane.f32.xlu0 %v1055_v56 }
 0x29d   : > { %1169 = vrot.lane.b32.xlu1 %v593_v26, %s4166_s15 }
 0x2a2   : > { %1093 = vrot.lane.b32.xlu0 %v523_v25, %s4166_s15 }
 0x30c   : > { %v1054_v57 = vpop.xlane.xlu0 %1053  ;;  %v1051_v58 = vpop.xlane.xlu1 %1050 }
 0x30d   : > { %v1062_v59 = vsub.f32 %v1046_v44, %v1054_v57  ;;  %v1061_v60 = vsub.f32 %v1045_v43, %v1051_v58  ;;  %v1700_v44 = vlaneseq }
 0x30f   : > { %v1067_v61 = vmul.f32 1.442695, %v1062_v59  ;;  %v1065_v62 = vmul.f32 1.442695, %v1061_v60  ;;  %v4435_v48 = vshrl.u32 %v1700_v44, 7 }
 0x311   : > { %4114 = vpow2.f32 %v1067_v61 }
 0x312   : > { %4116 = vpow2.f32 %v1065_v62 }
 0x315   : > { %v1060_v63 = vpop.xlane.xlu1 %1059  ;;  %v1057_v0 = vpop.xlane.xlu0 %1056 }
 0x316   : > { %v1064_v1 = vsub.f32 %v1048_v52, %v1060_v63  ;;  %v1063_v3 = vsub.f32 %v1047_v51, %v1057_v0  ;;  %v1702_v51 = vsub.s32 0, %v4435_v48  ;;  %v4443_v52 = vld [vmem:[%s4836_s8] sm:$0x3f] }
 0x318   : > { %v1071_v4 = vmul.f32 1.442695, %v1064_v1  ;;  %v1069_v5 = vmul.f32 1.442695, %v1063_v3  ;;  %v1703_v59 = vrot.slane %v4443_v52, %v1702_v51 }
 0x319   : > { %v1170_v6 = vpop.permute.xlu1 %1169  ;;  %v1094_v7 = vpop.permute.xlu0 %1093 }
 0x31a   : > { %4118 = vpow2.f32 %v1071_v4  ;;  %3887 = vmatpush3.msra.mxu0 %v1094_v7  ;;  %3892 = vmatpush3.msra.mxu1 %v1170_v6 }
 0x31b   : > { %4120 = vpow2.f32 %v1069_v5  ;;  %3896 = vmatprep.subr.mxu0 %v4162_v2  ;;  %3901 = vmatprep.subr.mxu1 %v4162_v2 }
 0x31e   : > { %v4115_v8 = vpop.eup %4114 }
 0x31f   : > { %v4117_v9 = vpop.eup %4116  ;;  %v1076_v10 = vsel %vm739_vm3, %v4115_v8, 0.0 }
 0x320   : > { %1077 = vadd.xlane.f32.xlu1 %v1076_v10  ;;  %v1073_v11 = vsel %vm739_vm3, %v4117_v9, 0.0  ;;  %v1730_v10 = vld [vmem:[%s4833_s5] sm:$0xff] }
 0x321   : > { %1074 = vadd.xlane.f32.xlu0 %v1073_v11  ;;  %v1822_v11 = vld [vmem:[%s4835_s7 + $0x38] sm:$0xff] }
 0x327   : > { %v4119_v12 = vpop.eup %4118 }
 0x328   : > { %v4121_v13 = vpop.eup %4120  ;;  %v1082_v15 = vsel %vm739_vm3, %v4119_v12, 0.0 }
 0x329   : > { %1083 = vadd.xlane.f32.xlu1 %v1082_v15  ;;  %v1079_v16 = vsel %vm739_vm3, %v4121_v13, 0.0  ;;  %v1819_v15 = vld [vmem:[%s4835_s7 + $0x20] sm:$0xff] }
 0x32a   : > { %1080 = vadd.xlane.f32.xlu0 %v1079_v16  ;;  %v1818_v16 = vld [vmem:[%s4835_s7 + $0x18] sm:$0xff] }
 0x33a   : > { %1245 = vrot.lane.b32.xlu1 %v4347_v33, %s4166_s15  ;;  %v1400_v33 = vld [vmem:[%s4832_s4 + $0x18] sm:$0xff] }
 0x340   : > { %1321 = vrot.lane.b32.xlu0 %v4349_v34, %s4166_s15 }
 0x3a9   : > { %v1078_v17 = vpop.xlane.xlu1 %1077 }
 0x3aa   : > { %4122 = vrcp.f32 %v1078_v17  ;;  %v1075_v18 = vpop.xlane.xlu0 %1074 }
 0x3ab   : > { %4124 = vrcp.f32 %v1075_v18 }
 0x3b2   : > { %v1084_v19 = vpop.xlane.xlu1 %1083 }
 0x3b3   : > { %4126 = vrcp.f32 %v1084_v19  ;;  %v1081_v20 = vpop.xlane.xlu0 %1080 }
 0x3b4   : > { %4128 = vrcp.f32 %v1081_v20  ;;  %v1722_v20 = vsub.s32 1, %v4435_v48 }
 0x3b6   : > { %v1246_v26 = vpop.permute.xlu1 %1245 }
 0x3b7   : > { %v4123_v21 = vpop.eup %4122  ;;  %v1322_v25 = vpop.permute.xlu0 %1321 }
 0x3b8   : > { %v4125_v22 = vpop.eup %4124  ;;  %v1090_v23 = vmul.f32 %v4123_v21, %v4115_v8  ;;  %v1733_v8 = vld [vmem:[%s4833_s5 + $0x18] sm:$0xff]  ;;  %v1727_v21 = vsub.s32 2, %v4435_v48 }
 0x3b9   : > { %v1089_v24 = vmul.f32 %v4125_v22, %v4117_v9  ;;  %v1731_v9 = vld [vmem:[%s4833_s5 + $0x8] sm:$0xff]  ;;  %v1723_v22 = vrot.slane %v4443_v52, %v1722_v20 }
 0x3ba   : > { %3894 = vmatmul.mubr.msk.f32.vlgmr.msra.gmra.mxu1 %vm739_vm3, %v1090_v23 }
 0x3bb   : > { %3889 = vmatmul.mubr.msk.f32.vlgmr.msra.gmra.mxu0 %vm739_vm3, %v1089_v24  ;;  %3902 = vmatpush3.msra.mxu1 %v1322_v25  ;;  %v1728_v25 = vrot.slane %v4443_v52, %v1727_v21 }
 0x3bc   : > { %3897 = vmatpush3.msra.mxu0 %v1246_v26  ;;  %3898 = vmatprep.mubr.msk.f32.mxu0 %vm4164_vm0, %v4162_v2 }
 0x3bd   : > { %3903 = vmatprep.mubr.msk.f32.mxu1 %vm4164_vm0, %v4162_v2  ;;  %3906 = vmatprep.subr.mxu0 %v4162_v2 }
 0x3be   : > { %3911 = vmatprep.subr.mxu1 %v4162_v2 }
 0x3c0   : > { %v4127_v27 = vpop.eup %4126 }
 0x3c1   : > { %v4129_v28 = vpop.eup %4128  ;;  %v1092_v29 = vmul.f32 %v4127_v27, %v4119_v12  ;;  %v1821_v12 = vld [vmem:[%s4835_s7 + $0x30] sm:$0xff] }
 0x3c2   : > { %v1091_v30 = vmul.f32 %v4129_v28, %v4121_v13  ;;  %v1820_v13 = vld [vmem:[%s4835_s7 + $0x28] sm:$0xff]  ;;  %v1817_v28 = vld [vmem:[%s4835_s7 + $0x10] sm:$0xff] }
 0x3c3   : > { %3904 = vmatmul.mubr.msk.f32.vlgmr.msra.gmra.mxu1 %vm739_vm3, %v1092_v29  ;;  %v1816_v29 = vld [vmem:[%s4835_s7 + $0x8] sm:$0xff] }
 0x3c4   : > { %3899 = vmatmul.mubr.msk.f32.vlgmr.msra.gmra.mxu0 %vm739_vm3, %v1091_v30  ;;  %3913 = vmatprep.mubr.msk.f32.mxu1 %vm4164_vm0, %v4162_v2  ;;  %v1815_v30 = vld [vmem:[%s4835_s7] sm:$0xff] }
 0x3c5   : > { %3908 = vmatprep.mubr.msk.f32.mxu0 %vm4164_vm0, %v4162_v2  ;;  %3907 = vmatpush3.msra.mxu0 %v1397_v31  ;;  %v3629_v31 = vld [vmem:[%s4834_s6] ss:$0 sm:$0xff] }
 0x3c6   : > { %3912 = vmatpush3.msra.mxu1 %v1398_v32  ;;  %3916 = vmatprep.subr.mxu0 %v4162_v2 }
 0x3c7   : > { %3921 = vmatprep.subr.mxu1 %v4162_v2 }
 0x47a   : > { %v1241_v34 = vpop.f32.mrf.mxu1 }
 0x47b   : > { %v1165_v36 = vpop.f32.mrf.mxu0  ;;  %3914 = vmatmul.mubr.msk.f32.vlgmr.msra.gmra.mxu1 %vm739_vm3, %v1241_v34 }
 0x47c   : > { %3909 = vmatmul.mubr.msk.f32.vlgmr.msra.gmra.mxu0 %vm739_vm3, %v1165_v36  ;;  %v3895_v37 = vpop.f32.mrf.mxu1  ;;  %3922 = vmatpush3.msra.mxu1 %v1400_v33  ;;  %v1825_v36 = vsub.s32 3, %v4435_v48 }
 0x47d   : > { %v3890_v38 = vpop.f32.mrf.mxu0  ;;  %3917 = vmatpush3.msra.mxu0 %v1399_v35  ;;  %3918 = vmatprep.mubr.msk.f32.mxu0 %vm4164_vm0, %v4162_v2 }
 0x47e   : > { %3923 = vmatprep.mubr.msk.f32.mxu1 %vm4164_vm0, %v4162_v2  ;;  %3926 = vmatprep.subr.mxu0 %v4162_v2  ;;  %v1826_v37 = vrot.slane %v4443_v52, %v1825_v36 }
 0x47f   : > { %3937 = vmatprep.subr.mxu1 %v4162_v2 }
 0x483   : > { %v1393_v39 = vpop.f32.mrf.mxu1 }
 0x484   : > { %v1317_v40 = vpop.f32.mrf.mxu0  ;;  %3924 = vmatmul.mubr.msk.f32.vlgmr.msra.gmra.mxu1 %vm739_vm3, %v1393_v39 }
 0x485   : > { %3919 = vmatmul.mubr.msk.f32.vlgmr.msra.gmra.mxu0 %vm739_vm3, %v1317_v40  ;;  %v3905_v41 = vpop.f32.mrf.mxu1  ;;  %3953 = vmatprep.mubr.msk.f32.mxu1 %vm4164_vm0, %v4162_v2 }
 0x486   : > { %v3900_v42 = vpop.f32.mrf.mxu0  ;;  %3934 = vmatprep.mubr.msk.f32.mxu0 %vm4164_vm0, %v4162_v2  ;;  %3927 = vmatpush3.msra.mxu0 %v1733_v8  ;;  %v3639_v8 = vld [vmem:[%s4830_s2 + $0xb0] sm:$0xff] }
 0x487   : > { %3928 = vmatprep.subr.mxu0 %v4162_v2  ;;  %3938 = vmatpush3.msra.mxu1 %v1822_v11  ;;  %v3646_v11 = vld [vmem:[%s4830_s2 + $0xe8] sm:$0xff] }
 0x488   : > { %3939 = vmatprep.subr.mxu1 %v4162_v2 }
 0x489   : > { %3940 = vmatpush3.msra.mxu1 %v1821_v12  ;;  %v3645_v12 = vld [vmem:[%s4830_s2 + $0xe0] sm:$0xff] }
 0x48a   : > { %3941 = vmatprep.subr.mxu1 %v4162_v2 }
 0x48b   : > { %3942 = vmatpush3.msra.mxu1 %v1820_v13  ;;  %v3653_v13 = vld [vmem:[%s4831_s3 + $0x4] ss:$0 sm:$0xff] }
 0x48c   : > { %3943 = vmatprep.subr.mxu1 %v4162_v2 }
 0x48d   : > { %3944 = vmatpush3.msra.mxu1 %v1819_v15 }
 0x48e   : > { %3945 = vmatprep.subr.mxu1 %v4162_v2 }
 0x48f   : > { %3946 = vmatpush3.msra.mxu1 %v1818_v16 }
 0x490   : > { %3947 = vmatprep.subr.mxu1 %v4162_v2 }
 0x491   : > { %3948 = vmatpush3.msra.mxu1 %v1817_v28  ;;  %v3656_v28 = vld [vmem:[%s4831_s3 + $0x7] ss:$0 sm:$0xff] }
 0x492   : > { %3949 = vmatprep.subr.mxu1 %v4162_v2 }
 0x493   : > { %3950 = vmatpush3.msra.mxu1 %v1816_v29 }
 0x494   : > { %3951 = vmatprep.subr.mxu1 %v4162_v2 }
 0x495   : > { %3952 = vmatpush3.msra.mxu1 %v1815_v30 }
 0x496   : > { %3978 = vmatprep.subr.mxu1 %v4162_v2 }
 0x53b   : > { %v1543_v43 = vpop.f32.mrf.mxu1 }
 0x53c   : > { %v1470_v45 = vpop.f32.mrf.mxu0  ;;  %v1694_v50 = vsel %vm452_vm2, %v1543_v43, 0.0 }
 0x53d   : > { %v3915_v46 = vpop.f32.mrf.mxu1  ;;  %v1693_v49 = vsel %vm452_vm2, %v1470_v45, 0.0 }
 0x53e   : > { %v3910_v47 = vpop.f32.mrf.mxu0  ;;  %v1695_v54 = vadd.f32 %v1694_v50, %v1693_v49  ;;  %v3636_v49 = vld [vmem:[%s4830_s2 + $0x98] sm:$0xff] }
 0x53f   : > { %v3644_v50 = vld [vmem:[%s4830_s2 + $0xd8] sm:$0xff] }
 0x544   : > { %v1689_v53 = vpop.f32.mrf.mxu1 }
 0x545   : > { %v1616_v55 = vpop.f32.mrf.mxu0  ;;  %v1698_v61 = vsel %vm452_vm2, %v1689_v53, 0.0  ;;  %v3635_v53 = vld [vmem:[%s4830_s2 + $0x90] sm:$0xff] }
 0x546   : > { %v1696_v56 = vsel %vm452_vm2, %v1616_v55, 0.0  ;;  %v3925_v57 = vpop.f32.mrf.mxu1  ;;  %v3634_v55 = vld [vmem:[%s4830_s2 + $0x88] sm:$0xff] }
 0x547   : > { %v1697_v58 = vadd.f32 %v1696_v56, %v1695_v54  ;;  %v3920_v60 = vpop.f32.mrf.mxu0  ;;  %v3643_v54 = vld [vmem:[%s4830_s2 + $0xd0] sm:$0xff]  ;;  %v3642_v56 = vld [vmem:[%s4830_s2 + $0xc8] sm:$0xff]  ;;  %v3633_v57 = vld [vmem:[%s4830_s2 + $0x80] sm:$0xff] }
 0x549   : > { %v1699_v62 = vadd.f32 %v1698_v61, %v1697_v58  ;;  %v3641_v58 = vld [vmem:[%s4830_s2 + $0xc0] sm:$0xff] }
 0x54b   : > { %v1704_v63 = vadd.f32 %v1703_v59, %v1699_v62  ;;  %v1917_v62 = vsub.s32 4, %v4435_v48 }
 0x54d   : > { %v1705_v0 = vadd.f32 %v1704_v63, %v4289_v14  ;;  %v1732_v14 = vld [vmem:[%s4833_s5 + $0x10] sm:$0xff]  ;;  %v1922_v63 = vsub.s32 5, %v4435_v48 }
 0x54e   : > { %3929 = vmatpush3.msra.mxu0 %v1732_v14  ;;  %v3637_v14 = vld [vmem:[%s4830_s2 + $0xa0] sm:$0xff] }
 0x54f   : > { %v1706_v1 = vsel %vm452_vm2, %v1705_v0, 0.0  ;;  %3930 = vmatprep.subr.mxu0 %v4162_v2 }
 0x550   : > { %1707 = vadd.xlane.f32.xlu1 %v1706_v1  ;;  %3931 = vmatpush3.msra.mxu0 %v1731_v9  ;;  %v3648_v9 = vld [vmem:[%s4830_s2 + $0xf8] sm:$0xff] }
 0x551   : > { %3932 = vmatprep.subr.mxu0 %v4162_v2 }
 0x552   : > { %3933 = vmatpush3.msra.mxu0 %v1730_v10  ;;  %v3647_v10 = vld [vmem:[%s4830_s2 + $0xf0] sm:$0xff] }
 0x553   : > { %3956 = vmatprep.subr.mxu0 %v4162_v2 }
 0x5d9   : > { %v1708_v3 = vpop.xlane.xlu1 %1707 }
 0x5da   : > { %v1710_v4 = vmul.f32 0.03125, %v1708_v3 }
 0x5dc   : > { %v1711_v5 = vsub.f32 %v1705_v0, %v1710_v4  ;;  %v1918_v0 = vrot.slane %v4443_v52, %v1917_v62  ;;  %v1923_v4 = vrot.slane %v4443_v52, %v1922_v63  ;;  %v3638_v52 = vld [vmem:[%s4830_s2 + $0xa8] sm:$0xff] }
 0x5de   : > { %v1712_v6 = vmul.f32 %v1711_v5, %v1711_v5 }
 0x5e0   : > { %v1713_v7 = vsel %vm452_vm2, %v1712_v6, 0.0 }
 0x5e1   : > { %1714 = vadd.xlane.f32.xlu0 %v1713_v7  ;;  %v3640_v7 = vld [vmem:[%s4830_s2 + $0xb8] sm:$0xff] }
 0x66a   : > { %v1715_v17 = vpop.xlane.xlu0 %1714 }
 0x66b   : > { %v1716_v18 = vmul.f32 0.03125, %v1715_v17 }
 0x66d   : > { %v1717_v19 = vadd.f32 1e-05, %v1716_v18 }
 0x66f   : > { %4130 = vrsqrt.f32 %v1717_v19 }
 0x67c   : > { %v4131_v23 = vpop.eup %4130 }
 0x67d   : > { %v1719_v24 = vmul.f32 %v4131_v23, %v1711_v5 }
 0x67f   : > { %v1724_v26 = vmul.f32 %v1723_v22, %v1719_v24  ;;  %v3654_v22 = vld [vmem:[%s4831_s3 + $0x5] ss:$0 sm:$0xff] }
 0x681   : > { %v1729_v27 = vadd.f32 %v1728_v25, %v1724_v26  ;;  %v3655_v25 = vld [vmem:[%s4831_s3 + $0x6] ss:$0 sm:$0xff] }
 0x683   : > { %3935 = vmatmul.mubr.msk.f32.vlgmr.msra.gmra.mxu0 %vm452_vm2, %v1729_v27 }
 0x684   : > { %3964 = vmatprep.mubr.msk.f32.mxu0 %vm4164_vm0, %v4162_v2  ;;  %3957 = vmatpush3.msra.mxu0 %v3636_v49 }
 0x685   : > { %3958 = vmatprep.subr.mxu0 %v4162_v2 }
 0x686   : > { %3959 = vmatpush3.msra.mxu0 %v3635_v53 }
 0x687   : > { %3960 = vmatprep.subr.mxu0 %v4162_v2 }
 0x688   : > { %3961 = vmatpush3.msra.mxu0 %v3634_v55 }
 0x689   : > { %3962 = vmatprep.subr.mxu0 %v4162_v2 }
 0x68a   : > { %3963 = vmatpush3.msra.mxu0 %v3633_v57 }
 0x68b   : > { %3967 = vmatprep.subr.mxu0 %v4162_v2 }
 0x743   : > { %v1810_v32 = vpop.f32.mrf.mxu0 }
 0x744   : > { %v1811_v33 = vadd.f32 %v3629_v31, %v1810_v32 }
 0x745   : > { %v3936_v34 = vpop.f32.mrf.mxu0 }
 0x746   : > { %v1814_v35 = vmax.f32 %v1811_v33, 0.0 }
 0x748   : > { %3954 = vmatmul.mubr.msk.f32.vlgmr.msra.gmra.mxu1 %vm1827_vm4, %v1814_v35 }
 0x749   : > { %3986 = vmatprep.mubr.msk.f32.mxu1 %vm4164_vm0, %v4162_v2  ;;  %3979 = vmatpush3.msra.mxu1 %v3644_v50 }
 0x74a   : > { %3980 = vmatprep.subr.mxu1 %v4162_v2 }
 0x74b   : > { %3981 = vmatpush3.msra.mxu1 %v3643_v54 }
 0x74c   : > { %3982 = vmatprep.subr.mxu1 %v4162_v2 }
 0x74d   : > { %3983 = vmatpush3.msra.mxu1 %v3642_v56 }
 0x74e   : > { %3984 = vmatprep.subr.mxu1 %v4162_v2 }
 0x74f   : > { %3985 = vmatpush3.msra.mxu1 %v3641_v58 }
 0x750   : > { %4000 = vmatprep.subr.mxu1 %v4162_v2 }
 0x808   : > { %v1897_v38 = vpop.f32.mrf.mxu1 }
 0x809   : > { %v1898_v39 = vadd.f32 %v1897_v38, %v1826_v37 }
 0x80a   : > { %v3955_v40 = vpop.f32.mrf.mxu1 }
 0x80b   : > { %v1901_v41 = vadd.f32 %v1898_v39, %v1729_v27 }
 0x80d   : > { %v1902_v42 = vsel %vm452_vm2, %v1901_v41, 0.0 }
 0x80e   : > { %1903 = vadd.xlane.f32.xlu0 %v1902_v42 }
 0x897   : > { %v1904_v43 = vpop.xlane.xlu0 %1903 }
 0x898   : > { %v1905_v44 = vmul.f32 0.03125, %v1904_v43 }
 0x89a   : > { %v1906_v45 = vsub.f32 %v1901_v41, %v1905_v44 }
 0x89c   : > { %v1907_v46 = vmul.f32 %v1906_v45, %v1906_v45 }
 0x89e   : > { %v1908_v47 = vsel %vm452_vm2, %v1907_v46, 0.0 }
 0x89f   : > { %1909 = vadd.xlane.f32.xlu1 %v1908_v47 }
 0x928   : > { %v1910_v59 = vpop.xlane.xlu1 %1909 }
 0x929   : > { %v1911_v60 = vmul.f32 0.03125, %v1910_v59 }
 0x92b   : > { %v1912_v61 = vadd.f32 1e-05, %v1911_v60 }
 0x92d   : > { %4132 = vrsqrt.f32 %v1912_v61 }
 0x93a   : > { %v4133_v1 = vpop.eup %4132 }
 0x93b   : > { %v1914_v3 = vmul.f32 %v4133_v1, %v1906_v45 }
 0x93d   : > { %v1919_v5 = vmul.f32 %v1918_v0, %v1914_v3 }
 0x93f   : > { %v4564_v6 = vadd.f32 %v1923_v4, %v1919_v5 }
 0x941   : > { %3965 = vmatmul.mubr.msk.f32.vlgmr.msra.gmra.mxu0 %vm452_vm2, %v4564_v6  ;;  %3987 = vmatmul.mubr.msk.f32.vlgmr.msra.gmra.mxu1 %vm452_vm2, %v4564_v6 }
 0x942   : > { %3968 = vmatpush3.msra.mxu0 %v3640_v7  ;;  %3975 = vmatprep.mubr.msk.f32.mxu0 %vm4164_vm0, %v4162_v2 }
 0x943   : > { %3969 = vmatprep.subr.mxu0 %v4162_v2  ;;  %4002 = vmatprep.mubr.msk.f32.mxu1 %vm4164_vm0, %v4162_v2 }
 0x944   : > { %3970 = vmatpush3.msra.mxu0 %v3639_v8 }
 0x945   : > { %3971 = vmatprep.subr.mxu0 %v4162_v2 }
 0x946   : > { %3972 = vmatpush3.msra.mxu0 %v3638_v52 }
 0x947   : > { %3973 = vmatprep.subr.mxu0 %v4162_v2 }
 0x948   : > { %3974 = vmatpush3.msra.mxu0 %v3637_v14 }
 0x949   : > { %3976 = vmatmul.mubr.msk.f32.vlgmr.msra.gmra.mxu0 %vm452_vm2, %v4564_v6  ;;  %3989 = vmatprep.subr.mxu0 %v4162_v2 }
 0x94a   : > { %3990 = vmatpush3.msra.mxu0 %v3648_v9  ;;  %3997 = vmatprep.mubr.msk.f32.mxu0 %vm4164_vm0, %v4162_v2 }
 0x94b   : > { %3991 = vmatprep.subr.mxu0 %v4162_v2 }
 0x94c   : > { %3992 = vmatpush3.msra.mxu0 %v3647_v10 }
 0x94d   : > { %3993 = vmatprep.subr.mxu0 %v4162_v2 }
 0x94e   : > { %3994 = vmatpush3.msra.mxu0 %v3646_v11 }
 0x94f   : > { %3995 = vmatprep.subr.mxu0 %v4162_v2 }
 0x950   : > { %3996 = vmatpush3.msra.mxu0 %v3645_v12 }
 0x951   : > { %3998 = vmatmul.mubr.msk.f32.vlgmr.msra.gmra.mxu0 %vm452_vm2, %v4564_v6  ;;  %4010 = vmatprep.subr.mxu0 %v4162_v2 }
 0x952   : > { %4012 = vmatprep.mubr.msk.f32.mxu0 %vm4164_vm0, %v4162_v2 }
 0xa01   : > { %v2042_v15 = vpop.f32.mrf.mxu0  ;;  %v2182_v16 = vpop.f32.mrf.mxu1 }
 0xa02   : > { %v2043_v17 = vadd.f32 %v3653_v13, %v2042_v15  ;;  %v4625_v27 = vadd.f32 %v3655_v25, %v2182_v16 }
 0xa03   : > { %v3966_v18 = vpop.f32.mrf.mxu0  ;;  %v3988_v19 = vpop.f32.mrf.mxu1 }
 0xa04   : > { %2257 = vrot.lane.b32.xlu0 %v2043_v17, %s4165_s28 }
 0xa09   : > { %v2112_v23 = vpop.f32.mrf.mxu0 }
 0xa0a   : > { %v2113_v24 = vadd.f32 %v3654_v22, %v2112_v23 }
 0xa0b   : > { %v3977_v26 = vpop.f32.mrf.mxu0 }
 0xa0c   : > { %2334 = vrot.lane.b32.xlu1 %v2113_v24, %s4165_s28 }
 0xa10   : > { %2411 = vrot.lane.b32.xlu1 %v4625_v27, %s4165_s28 }
 0xa11   : > { %v2252_v29 = vpop.f32.mrf.mxu0 }
 0xa12   : > { %v4632_v30 = vadd.f32 %v3656_v28, %v2252_v29 }
 0xa13   : > { %v3999_v31 = vpop.f32.mrf.mxu0 }
 0xa14   : > { %2488 = vrot.lane.b32.xlu0 %v4632_v30, %s4165_s28 }
 0xa76   : > { %v2258_v32 = vpop.permute.xlu0 %2257 }
 0xa77   : > { %4001 = vmatpush3.xpose.msk.msra.mxu1 %vm739_vm3, %v2258_v32 }
 0xa78   : > { %4005 = vmatprep.subr.mxu1 %v4162_v2 }
 0xa7a   : > { %4003 = vmatmul.mubr.msk.f32.vlgmr.msra.gmra.mxu1 %vm739_vm3, %v2043_v17 }
 0xa7b   : > { %4007 = vmatprep.mubr.msk.f32.mxu1 %vm4164_vm0, %v4162_v2 }
 0xa7e   : > { %v2335_v33 = vpop.permute.xlu1 %2334 }
 0xa7f   : > { %4006 = vmatpush3.xpose.msk.msra.mxu1 %vm739_vm3, %v2335_v33  ;;  %v3673_v33 = vld [vmem:[%s4832_s4 + $0x20] sm:$0xff] }
 0xa80   : > { %4015 = vmatprep.subr.mxu1 %v4162_v2 }
 0xa82   : > { %4008 = vmatmul.mubr.msk.f32.vlgmr.msra.gmra.mxu1 %vm739_vm3, %v2113_v24  ;;  %v2412_v34 = vpop.permute.xlu1 %2411 }
 0xa83   : > { %4011 = vmatpush3.xpose.msk.msra.mxu0 %vm739_vm3, %v2412_v34  ;;  %4017 = vmatprep.mubr.msk.f32.mxu1 %vm4164_vm0, %v4162_v2  ;;  %v3674_v34 = vld [vmem:[%s4832_s4 + $0x28] sm:$0xff] }
 0xa84   : > { %4020 = vmatprep.subr.mxu0 %v4162_v2 }
 0xa86   : > { %4013 = vmatmul.mubr.msk.f32.vlgmr.msra.gmra.mxu0 %vm739_vm3, %v4625_v27  ;;  %v2489_v35 = vpop.permute.xlu0 %2488 }
 0xa87   : > { %4016 = vmatpush3.xpose.msk.msra.mxu1 %vm739_vm3, %v2489_v35  ;;  %4022 = vmatprep.mubr.msk.f32.mxu0 %vm4164_vm0, %v4162_v2  ;;  %v3675_v35 = vld [vmem:[%s4832_s4 + $0x30] sm:$0xff] }
 0xa88   : > { %4025 = vmatprep.subr.mxu1 %v4162_v2 }
 0xa8a   : > { %4018 = vmatmul.mubr.msk.f32.vlgmr.msra.gmra.mxu1 %vm739_vm3, %v4632_v30 }
 0xa8b   : > { %4027 = vmatprep.mubr.msk.f32.mxu1 %vm4164_vm0, %v4162_v2 }
 0xb3a   : > { %v2329_v37 = vpop.f32.mrf.mxu1 }
 0xb3b   : > { %v2564_v38 = vmul.f32 0.35355338, %v2329_v37 }
 0xb3c   : > { %v4004_v39 = vpop.f32.mrf.mxu1 }
 0xb3d   : > { %v2568_v40 = vsel %vm739_vm3, %v2564_v38, -inf  ;;  %v3676_v39 = vld [vmem:[%s4832_s4 + $0x38] sm:$0xff] }
 0xb3e   : > { %2569 = vmax.xlane.f32.xlu1 %v2568_v40 }
 0xb42   : > { %v2406_v41 = vpop.f32.mrf.mxu1 }
 0xb43   : > { %v2565_v42 = vmul.f32 0.35355338, %v2406_v41 }
 0xb44   : > { %v4009_v43 = vpop.f32.mrf.mxu1 }
 0xb45   : > { %v2571_v44 = vsel %vm739_vm3, %v2565_v42, -inf }
 0xb46   : > { %2572 = vmax.xlane.f32.xlu0 %v2571_v44  ;;  %v2483_v45 = vpop.f32.mrf.mxu0 }
 0xb47   : > { %v2566_v46 = vmul.f32 0.35355338, %v2483_v45 }
 0xb48   : > { %v4014_v47 = vpop.f32.mrf.mxu0 }
 0xb49   : > { %v2574_v49 = vsel %vm739_vm3, %v2566_v46, -inf }
 0xb4a   : > { %v2560_v50 = vpop.f32.mrf.mxu1  ;;  %2575 = vmax.xlane.f32.xlu0 %v2574_v49 }
 0xb4b   : > { %v2567_v53 = vmul.f32 0.35355338, %v2560_v50 }
 0xb4c   : > { %v4019_v54 = vpop.f32.mrf.mxu1 }
 0xb4d   : > { %v2577_v55 = vsel %vm739_vm3, %v2567_v53, -inf }
 0xb4e   : > { %2578 = vmax.xlane.f32.xlu1 %v2577_v55 }
 0xb5f   : > { %2688 = vrot.lane.b32.xlu1 %v2113_v24, %s4166_s15 }
 0xb60   : > { %2612 = vrot.lane.b32.xlu0 %v2043_v17, %s4166_s15 }
 0xbc7   : > { %v2570_v56 = vpop.xlane.xlu1 %2569 }
 0xbc8   : > { %v2580_v57 = vsub.f32 %v2564_v38, %v2570_v56 }
 0xbca   : > { %v2584_v58 = vmul.f32 1.442695, %v2580_v57  ;;  %v4722_v57 = vld [vmem:[%s4836_s8 + $0x8] sm:$0x3f] }
 0xbcc   : > { %4134 = vpow2.f32 %v2584_v58 }
 0xbcf   : > { %v2573_v59 = vpop.xlane.xlu0 %2572 }
 0xbd0   : > { %v2581_v60 = vsub.f32 %v2565_v42, %v2573_v59 }
 0xbd2   : > { %v2586_v61 = vmul.f32 1.442695, %v2581_v60 }
 0xbd3   : > { %v2576_v0 = vpop.xlane.xlu0 %2575 }
 0xbd4   : > { %4136 = vpow2.f32 %v2586_v61  ;;  %v2582_v1 = vsub.f32 %v2566_v46, %v2576_v0  ;;  %v3223_v0 = vrot.slane %v4722_v57, %v1702_v51  ;;  %v3684_v51 = vld [vmem:[%s4833_s5 + $0x38] sm:$0xff] }
 0xbd6   : > { %v2588_v3 = vmul.f32 1.442695, %v2582_v1 }
 0xbd7   : > { %v2579_v4 = vpop.xlane.xlu1 %2578  ;;  %v2613_v5 = vpop.permute.xlu0 %2612 }
 0xbd8   : > { %4138 = vpow2.f32 %v2588_v3  ;;  %v2583_v7 = vsub.f32 %v2567_v53, %v2579_v4  ;;  %4021 = vmatpush3.msra.mxu0 %v2613_v5 }
 0xbd9   : > { %v4135_v8 = vpop.eup %4134  ;;  %4030 = vmatprep.subr.mxu0 %v4162_v2 }
 0xbda   : > { %v2590_v52 = vmul.f32 1.442695, %v2583_v7  ;;  %v2592_v14 = vsel %vm739_vm3, %v4135_v8, 0.0 }
 0xbdb   : > { %v2689_v9 = vpop.permute.xlu1 %2688  ;;  %2593 = vadd.xlane.f32.xlu0 %v2592_v14 }
 0xbdc   : > { %4140 = vpow2.f32 %v2590_v52  ;;  %4026 = vmatpush3.msra.mxu1 %v2689_v9 }
 0xbdd   : > { %4035 = vmatprep.subr.mxu1 %v4162_v2 }
 0xbe1   : > { %v4137_v10 = vpop.eup %4136 }
 0xbe2   : > { %v2595_v11 = vsel %vm739_vm3, %v4137_v10, 0.0 }
 0xbe3   : > { %2596 = vadd.xlane.f32.xlu1 %v2595_v11 }
 0xbe5   : > { %v4139_v12 = vpop.eup %4138 }
 0xbe6   : > { %v2598_v13 = vsel %vm739_vm3, %v4139_v12, 0.0 }
 0xbe7   : > { %2599 = vadd.xlane.f32.xlu0 %v2598_v13  ;;  %v3681_v13 = vld [vmem:[%s4833_s5 + $0x20] sm:$0xff] }
 0xbe9   : > { %v4141_v15 = vpop.eup %4140 }
 0xbea   : > { %v2601_v16 = vsel %vm739_vm3, %v4141_v15, 0.0 }
 0xbeb   : > { %2602 = vadd.xlane.f32.xlu1 %v2601_v16  ;;  %v3694_v16 = vld [vmem:[%s4835_s7 + $0x70] sm:$0xff] }
 0xbfc   : > { %2764 = vrot.lane.b32.xlu1 %v4625_v27, %s4166_s15 }
 0xbfd   : > { %2840 = vrot.lane.b32.xlu0 %v4632_v30, %s4166_s15 }
 0xc64   : > { %v2594_v17 = vpop.xlane.xlu0 %2593 }
 0xc65   : > { %4142 = vrcp.f32 %v2594_v17  ;;  %v3693_v17 = vld [vmem:[%s4835_s7 + $0x68] sm:$0xff] }
 0xc6c   : > { %v2597_v18 = vpop.xlane.xlu1 %2596 }
 0xc6d   : > { %4144 = vrcp.f32 %v2597_v18  ;;  %v3692_v18 = vld [vmem:[%s4835_s7 + $0x60] sm:$0xff] }
 0xc70   : > { %v2600_v19 = vpop.xlane.xlu0 %2599 }
 0xc71   : > { %4146 = vrcp.f32 %v2600_v19  ;;  %v3691_v19 = vld [vmem:[%s4835_s7 + $0x58] sm:$0xff] }
 0xc72   : > { %v4143_v22 = vpop.eup %4142 }
 0xc73   : > { %v2608_v23 = vmul.f32 %v4143_v22, %v4135_v8 }
 0xc74   : > { %v2603_v24 = vpop.xlane.xlu1 %2602  ;;  %v2841_v28 = vpop.permute.xlu0 %2840 }
 0xc75   : > { %4148 = vrcp.f32 %v2603_v24  ;;  %4023 = vmatmul.mubr.msk.f32.vlgmr.msra.gmra.mxu0 %vm739_vm3, %v2608_v23 }
 0xc76   : > { %4032 = vmatprep.mubr.msk.f32.mxu0 %vm4164_vm0, %v4162_v2 }
 0xc78   : > { %v2765_v25 = vpop.permute.xlu1 %2764 }
 0xc79   : > { %4031 = vmatpush3.msra.mxu0 %v2765_v25  ;;  %v3242_v25 = vrot.slane %v4722_v57, %v1722_v20  ;;  %v3689_v20 = vld [vmem:[%s4835_s7 + $0x48] sm:$0xff] }
 0xc7a   : > { %v4145_v26 = vpop.eup %4144  ;;  %4040 = vmatprep.subr.mxu0 %v4162_v2 }
 0xc7b   : > { %v2609_v27 = vmul.f32 %v4145_v26, %v4137_v10 }
 0xc7d   : > { %4028 = vmatmul.mubr.msk.f32.vlgmr.msra.gmra.mxu1 %vm739_vm3, %v2609_v27 }
 0xc7e   : > { %v4147_v29 = vpop.eup %4146  ;;  %4036 = vmatpush3.msra.mxu1 %v2841_v28  ;;  %4037 = vmatprep.mubr.msk.f32.mxu1 %vm4164_vm0, %v4162_v2  ;;  %v3247_v28 = vrot.slane %v4722_v57, %v1727_v21  ;;  %v3688_v21 = vld [vmem:[%s4835_s7 + $0x40] sm:$0xff] }
 0xc7f   : > { %v2610_v30 = vmul.f32 %v4147_v29, %v4139_v12  ;;  %4045 = vmatprep.subr.mxu1 %v4162_v2  ;;  %v3683_v12 = vld [vmem:[%s4833_s5 + $0x30] sm:$0xff] }
 0xc81   : > { %4033 = vmatmul.mubr.msk.f32.vlgmr.msra.gmra.mxu0 %vm739_vm3, %v2610_v30 }
 0xc82   : > { %v4149_v31 = vpop.eup %4148  ;;  %4042 = vmatprep.mubr.msk.f32.mxu0 %vm4164_vm0, %v4162_v2  ;;  %4041 = vmatpush3.msra.mxu0 %v3673_v33 }
 0xc83   : > { %v2611_v32 = vmul.f32 %v4149_v31, %v4141_v15  ;;  %4050 = vmatprep.subr.mxu0 %v4162_v2  ;;  %v3695_v15 = vld [vmem:[%s4835_s7 + $0x78] sm:$0xff]  ;;  %v3690_v31 = vld [vmem:[%s4835_s7 + $0x50] sm:$0xff] }
 0xc85   : > { %4038 = vmatmul.mubr.msk.f32.vlgmr.msra.gmra.mxu1 %vm739_vm3, %v2611_v32  ;;  %v3686_v32 = vld [vmem:[%s4834_s6 + $0x1] ss:$0 sm:$0xff] }
 0xc86   : > { %4047 = vmatprep.mubr.msk.f32.mxu1 %vm4164_vm0, %v4162_v2  ;;  %4046 = vmatpush3.msra.mxu1 %v3674_v34 }
 0xc87   : > { %4055 = vmatprep.subr.mxu1 %v4162_v2 }
 0xd35   : > { %v2684_v37 = vpop.f32.mrf.mxu0 }
 0xd36   : > { %4043 = vmatmul.mubr.msk.f32.vlgmr.msra.gmra.mxu0 %vm739_vm3, %v2684_v37 }
 0xd37   : > { %v4024_v38 = vpop.f32.mrf.mxu0  ;;  %4051 = vmatpush3.msra.mxu0 %v3675_v35  ;;  %4052 = vmatprep.mubr.msk.f32.mxu0 %vm4164_vm0, %v4162_v2 }
 0xd38   : > { %4060 = vmatprep.subr.mxu0 %v4162_v2  ;;  %v3348_v38 = vrot.slane %v4722_v57, %v1825_v36  ;;  %v3448_v36 = vld [vmem:[%s4837_s9 + $0x10] sm:$0xff] }
 0xd3d   : > { %v2760_v40 = vpop.f32.mrf.mxu1 }
 0xd3e   : > { %4048 = vmatmul.mubr.msk.f32.vlgmr.msra.gmra.mxu1 %vm739_vm3, %v2760_v40 }
 0xd3f   : > { %v4029_v41 = vpop.f32.mrf.mxu1  ;;  %4056 = vmatpush3.msra.mxu1 %v3676_v39  ;;  %4057 = vmatprep.mubr.msk.f32.mxu1 %vm4164_vm0, %v4162_v2 }
 0xd40   : > { %4071 = vmatprep.subr.mxu1 %v4162_v2 }
 0xd41   : > { %v2836_v42 = vpop.f32.mrf.mxu0 }
 0xd42   : > { %4053 = vmatmul.mubr.msk.f32.vlgmr.msra.gmra.mxu0 %vm739_vm3, %v2836_v42 }
 0xd43   : > { %v4034_v43 = vpop.f32.mrf.mxu0  ;;  %4068 = vmatprep.mubr.msk.f32.mxu0 %vm4164_vm0, %v4162_v2  ;;  %4061 = vmatpush3.msra.mxu0 %v3684_v51 }
 0xd44   : > { %4062 = vmatprep.subr.mxu0 %v4162_v2 }
 0xd45   : > { %v2912_v44 = vpop.f32.mrf.mxu1  ;;  %4063 = vmatpush3.msra.mxu0 %v3683_v12 }
 0xd46   : > { %4058 = vmatmul.mubr.msk.f32.vlgmr.msra.gmra.mxu1 %vm739_vm3, %v2912_v44  ;;  %4064 = vmatprep.subr.mxu0 %v4162_v2 }
 0xd47   : > { %v4039_v45 = vpop.f32.mrf.mxu1  ;;  %4087 = vmatprep.mubr.msk.f32.mxu1 %vm4164_vm0, %v4162_v2  ;;  %4072 = vmatpush3.msra.mxu1 %v3695_v15 }
 0xd48   : > { %4073 = vmatprep.subr.mxu1 %v4162_v2 }
 0xd49   : > { %4074 = vmatpush3.msra.mxu1 %v3694_v16 }
 0xd4a   : > { %4075 = vmatprep.subr.mxu1 %v4162_v2 }
 0xd4b   : > { %4076 = vmatpush3.msra.mxu1 %v3693_v17 }
 0xd4c   : > { %4077 = vmatprep.subr.mxu1 %v4162_v2 }
 0xd4d   : > { %4078 = vmatpush3.msra.mxu1 %v3692_v18 }
 0xd4e   : > { %4079 = vmatprep.subr.mxu1 %v4162_v2 }
 0xd4f   : > { %4080 = vmatpush3.msra.mxu1 %v3691_v19 }
 0xd50   : > { %4081 = vmatprep.subr.mxu1 %v4162_v2 }
 0xd51   : > { %4082 = vmatpush3.msra.mxu1 %v3690_v31 }
 0xd52   : > { %4083 = vmatprep.subr.mxu1 %v4162_v2 }
 0xd53   : > { %4084 = vmatpush3.msra.mxu1 %v3689_v20 }
 0xd54   : > { %4085 = vmatprep.subr.mxu1 %v4162_v2 }
 0xd55   : > { %4086 = vmatpush3.msra.mxu1 %v3688_v21 }
 0xdf6   : > { %v2990_v46 = vpop.f32.mrf.mxu0 }
 0xdf7   : > { %v3213_v55 = vsel %vm452_vm2, %v2990_v46, 0.0 }
 0xdf8   : > { %v4044_v47 = vpop.f32.mrf.mxu0 }
 0xdfe   : > { %v3063_v49 = vpop.f32.mrf.mxu1 }
 0xdff   : > { %v3214_v53 = vsel %vm452_vm2, %v3063_v49, 0.0 }
 0xe00   : > { %v4049_v50 = vpop.f32.mrf.mxu1  ;;  %v3215_v58 = vadd.f32 %v3214_v53, %v3213_v55  ;;  %v3447_v53 = vld [vmem:[%s4837_s9 + $0x8] sm:$0xff] }
 0xe01   : > { %v3449_v50 = vld [vmem:[%s4837_s9 + $0x18] sm:$0xff] }
 0xe02   : > { %v3136_v54 = vpop.f32.mrf.mxu0 }
 0xe03   : > { %v3216_v56 = vsel %vm452_vm2, %v3136_v54, 0.0  ;;  %v3446_v54 = vld [vmem:[%s4837_s9] sm:$0xff] }
 0xe04   : > { %v4054_v59 = vpop.f32.mrf.mxu0  ;;  %v3217_v60 = vadd.f32 %v3216_v56, %v3215_v58 }
 0xe05   : > { %v3439_v59 = vrot.slane %v4722_v57, %v1917_v62 }
 0xe06   : > { %v3209_v61 = vpop.f32.mrf.mxu1 }
 0xe07   : > { %v3218_v1 = vsel %vm452_vm2, %v3209_v61, 0.0 }
 0xe08   : > { %v3219_v3 = vadd.f32 %v3218_v1, %v3217_v60  ;;  %v4059_v4 = vpop.f32.mrf.mxu1 }
 0xe0a   : > { %v3224_v5 = vadd.f32 %v3223_v0, %v3219_v3  ;;  %v3444_v0 = vrot.slane %v4722_v57, %v1922_v63 }
 0xe0c   : > { %v3225_v7 = vadd.f32 %v3224_v5, %v4564_v6  ;;  %v3682_v6 = vld [vmem:[%s4833_s5 + $0x28] sm:$0xff] }
 0xe0d   : > { %4065 = vmatpush3.msra.mxu0 %v3682_v6 }
 0xe0e   : > { %v3226_v8 = vsel %vm452_vm2, %v3225_v7, 0.0  ;;  %4066 = vmatprep.subr.mxu0 %v4162_v2 }
 0xe0f   : > { %3227 = vadd.xlane.f32.xlu1 %v3226_v8  ;;  %4067 = vmatpush3.msra.mxu0 %v3681_v13 }
 0xe10   : > { %4090 = vmatprep.subr.mxu0 %v4162_v2 }
 0xe98   : > { %v3228_v52 = vpop.xlane.xlu1 %3227 }
 0xe99   : > { %v3229_v14 = vmul.f32 0.03125, %v3228_v52 }
 0xe9b   : > { %v3230_v9 = vsub.f32 %v3225_v7, %v3229_v14 }
 0xe9d   : > { %v3231_v10 = vmul.f32 %v3230_v9, %v3230_v9 }
 0xe9f   : > { %v3232_v11 = vsel %vm452_vm2, %v3231_v10, 0.0 }
 0xea0   : > { %3233 = vadd.xlane.f32.xlu0 %v3232_v11 }
 0xf29   : > { %v3234_v22 = vpop.xlane.xlu0 %3233 }
 0xf2a   : > { %v3235_v23 = vmul.f32 0.03125, %v3234_v22 }
 0xf2c   : > { %v3236_v24 = vadd.f32 1e-05, %v3235_v23 }
 0xf2e   : > { %4150 = vrsqrt.f32 %v3236_v24 }
 0xf3b   : > { %v4151_v26 = vpop.eup %4150 }
 0xf3c   : > { %v3238_v27 = vmul.f32 %v4151_v26, %v3230_v9 }
 0xf3e   : > { %v3243_v29 = vmul.f32 %v3242_v25, %v3238_v27 }
 0xf40   : > { %v3248_v30 = vadd.f32 %v3247_v28, %v3243_v29 }
 0xf42   : > { %4069 = vmatmul.mubr.msk.f32.vlgmr.msra.gmra.mxu0 %vm452_vm2, %v3248_v30 }
 0xf43   : > { %4098 = vmatprep.mubr.msk.f32.mxu0 %vm4164_vm0, %v4162_v2  ;;  %4091 = vmatpush3.msra.mxu0 %v3449_v50 }
 0xf44   : > { %4092 = vmatprep.subr.mxu0 %v4162_v2 }
 0xf45   : > { %4093 = vmatpush3.msra.mxu0 %v3448_v36 }
 0xf46   : > { %4094 = vmatprep.subr.mxu0 %v4162_v2 }
 0xf47   : > { %4095 = vmatpush3.msra.mxu0 %v3447_v53 }
 0xf48   : > { %4096 = vmatprep.subr.mxu0 %v4162_v2  ;;  %v3697_v2 = vld [vmem:[%s4838_s10] ss:$0 sm:$0xff] }
 0xf49   : > { %4097 = vmatpush3.msra.mxu0 %v3446_v54 }
0x1002   : > { %v3331_v33 = vpop.f32.mrf.mxu0 }
0x1003   : > { %v3332_v34 = vadd.f32 %v3686_v32, %v3331_v33 }
0x1004   : > { %v4070_v35 = vpop.f32.mrf.mxu0 }
0x1005   : > { %v3335_v37 = vmax.f32 %v3332_v34, 0.0 }
0x1007   : > { %4088 = vmatmul.mubr.msk.f32.vlgmr.msra.gmra.mxu1 %vm1827_vm4, %v3335_v37 }
0x10c7   : > { %v3418_v39 = vpop.f32.mrf.mxu1 }
0x10c8   : > { %v3419_v40 = vadd.f32 %v3418_v39, %v3348_v38 }
0x10c9   : > { %v4089_v41 = vpop.f32.mrf.mxu1 }
0x10ca   : > { %v3422_v42 = vadd.f32 %v3419_v40, %v3248_v30 }
0x10cc   : > { %v3423_v43 = vsel %vm452_vm2, %v3422_v42, 0.0 }
0x10cd   : > { %3424 = vadd.xlane.f32.xlu0 %v3423_v43 }
0x1156   : > { %v3425_v44 = vpop.xlane.xlu0 %3424 }
0x1157   : > { %v3426_v45 = vmul.f32 0.03125, %v3425_v44 }
0x1159   : > { %v3427_v46 = vsub.f32 %v3422_v42, %v3426_v45 }
0x115b   : > { %v3428_v47 = vmul.f32 %v3427_v46, %v3427_v46 }
0x115d   : > { %v3429_v49 = vsel %vm452_vm2, %v3428_v47, 0.0 }
0x115e   : > { %3430 = vadd.xlane.f32.xlu1 %v3429_v49 }
0x11e7   : > { %v3431_v55 = vpop.xlane.xlu1 %3430 }
0x11e8   : > { %v3432_v56 = vmul.f32 0.03125, %v3431_v55 }
0x11ea   : > { %v3433_v58 = vadd.f32 1e-05, %v3432_v56 }
0x11ec   : > { %4152 = vrsqrt.f32 %v3433_v58 }
0x11f9   : > { %v4153_v60 = vpop.eup %4152 }
0x11fa   : > { %v3435_v61 = vmul.f32 %v4153_v60, %v3427_v46 }
0x11fc   : > { %v3440_v1 = vmul.f32 %v3439_v59, %v3435_v61 }
0x11fe   : > { %v3445_v3 = vadd.f32 %v3444_v0, %v3440_v1 }
0x1200   : > { %4099 = vmatmul.mubr.msk.f32.vlgmr.msra.gmra.mxu0 %vm452_vm2, %v3445_v3 }
0x12c0   : > { %v3526_v4 = vpop.f32.mrf.mxu0 }
0x12c1   : > { %v3527_v62 = vadd.f32 %v3697_v2, %v3526_v4 }
0x12c2   : > { %v4100_v5 = vpop.f32.mrf.mxu0 }
0x12c3   : > { %3531 = vst.msk [vmem:[%s398_s13] sm:$0xff] %vm3530_vm5, %v3527_v62 }
0x12c4 PF: > { %s21_s17 = sadd.s32 1, %s4160_s17  }
0x12c5   : > { %p18_p4 = scmp.ge.s32.totalorder %s21_s17, 4  }
0x12c7   :  { %20 = sbr.rel (!%p18_p4) target bundleno = 1 (0x1), region = 104 }

</bundles_post_ra>
